<compile_context>
chip_gen: v7x
topology: tpu7x:2x2x1
jax: 0.10.0
libtpu: 0.0.40
codegen_flags: <defaults>
</compile_context>

<pallas_src>
import functools

import numpy as np
import jax
import jax.numpy as jnp
from jax import lax
from jax.experimental import pallas as pl
from jax.experimental.pallas import tpu as pltpu


def _round_up(x, m):
    return ((x + m - 1) // m) * m


# ----------------------------------------------------------------------------
# Deterministic parameter construction (librosa.filters.mel(htk=True) + STFT
# Fourier basis with a periodic Hann window), replicated in numpy.
# ----------------------------------------------------------------------------
def _hz_to_mel_htk(f):
    return 2595.0 * np.log10(1.0 + np.asarray(f, dtype=np.float64) / 700.0)


def _mel_to_hz_htk(m):
    return 700.0 * (10.0 ** (np.asarray(m, dtype=np.float64) / 2595.0) - 1.0)


def mel_filterbank(sr, n_fft, n_mels, fmin=0.0, fmax=None):
    """librosa.filters.mel(..., htk=True, norm='slaney') re-implemented."""
    if fmax is None:
        fmax = sr / 2.0
    n_freqs = n_fft // 2 + 1
    fftfreqs = np.linspace(0.0, sr / 2.0, n_freqs)
    mel_pts = np.linspace(_hz_to_mel_htk(fmin), _hz_to_mel_htk(fmax), n_mels + 2)
    hz_pts = _mel_to_hz_htk(mel_pts)
    fdiff = np.diff(hz_pts)
    ramps = hz_pts[:, None] - fftfreqs[None, :]
    weights = np.zeros((n_mels, n_freqs), dtype=np.float64)
    for i in range(n_mels):
        lower = -ramps[i] / fdiff[i]
        upper = ramps[i + 2] / fdiff[i + 1]
        weights[i] = np.maximum(0.0, np.minimum(lower, upper))
    enorm = 2.0 / (hz_pts[2: n_mels + 2] - hz_pts[:n_mels])   # slaney norm
    weights *= enorm[:, None]
    return weights.astype(np.float32)


def stft_forward_basis(n_fft, win_length):
    """Real/imag DFT rows windowed by a periodic Hann window, (2*cutoff, n_fft)."""
    cutoff = n_fft // 2 + 1
    fourier = np.fft.fft(np.eye(n_fft))
    basis = np.vstack([np.real(fourier[:cutoff]), np.imag(fourier[:cutoff])])
    n = np.arange(win_length)
    win = 0.5 - 0.5 * np.cos(2.0 * np.pi * n / win_length)   # hann, fftbins=True
    pad = (n_fft - win_length) // 2
    win_full = np.zeros(n_fft)
    win_full[pad: pad + win_length] = win                    # pad_center
    return (basis * win_full[None, :]).astype(np.float32)


# ----------------------------------------------------------------------------
# Pallas kernel.  One grid step handles one (batch, frame-tile) pair.
#   chunk_ref:  (CR, hop)              hop-blocks of padded audio covering the tile
#   w_ref:      (k_ext, 2*cutoff_pad)  windowed Fourier basis (transposed; real cols
#                                      [0:cutoff), imag cols [cutoff_pad:...))
#   melb_ref:   (n_mels_blk, cutoff_pad) mel basis, zero padded
#   out_ref:    (n_mels_blk, TF)       log-mel tile, already (mels x frames)
#   frames_ref: (TF, k_ext)            VMEM scratch frame matrix
# ----------------------------------------------------------------------------
def _mel_kernel(chunk_ref, w_ref, melb_ref, out_ref, frames_ref, *,
                n_taps, tile_frames, hop, cutoff_pad, clamp, is_half):
    # 1) Build the frame matrix: frames[u, j*hop:(j+1)*hop] = chunk[u + j, :].
    #    Sublane-offset loads / lane-offset stores run in vld/vst/XLU slots, which
    #    are idle while the MXU is the binding unit.
    for j in range(n_taps):
        frames_ref[:, pl.ds(j * hop, hop)] = chunk_ref[pl.ds(j, tile_frames), :]

    # 2) One wide-K MXU matmul (K = n_fft), f32 accumulate.  Real / imag halves are
    #    lane-tile-aligned column blocks, so the split below is a free slice.
    ft = jnp.dot(frames_ref[...], w_ref[...], preferred_element_type=jnp.float32)
    real = ft[:, :cutoff_pad]
    imag = ft[:, cutoff_pad:]
    mag = jnp.sqrt(real * real + imag * imag)                # (TF, cutoff_pad) f32

    # 3) mel^T = mel_basis . mag^T  (NT contraction on the cutoff axis) so the
    #    result is already (n_mels_blk, TF): lane-dense, unpadded output stores.
    mag = mag.astype(melb_ref.dtype)
    mel_t = lax.dot_general(melb_ref[...], mag,
                            dimension_numbers=(((1,), (1,)), ((), ())),
                            preferred_element_type=jnp.float32)

    if is_half:
        # torch does .half() before clamp/log: quantize to f16, keep math in f32.
        mel_t = mel_t.astype(jnp.float16).astype(jnp.float32)
    mel_t = jnp.log(jnp.maximum(mel_t, jnp.asarray(clamp, jnp.float32)))
    out_ref[...] = mel_t.astype(out_ref.dtype)


# ----------------------------------------------------------------------------
# Wrapper: padding, hop-block regrouping, weight preparation, pallas_call.
# ----------------------------------------------------------------------------
def mel_spectrogram(
    audio,
    *,
    n_mel_channels,
    sampling_rate,
    win_length,
    hop_length,
    n_fft=None,
    mel_fmin=0.0,
    mel_fmax=None,
    clamp=1e-5,
    is_half=False,
    use_bf16=True,       # bf16 MXU inputs + f32 accumulate (default); False = exact f32
    frame_tile=None,
):
    n_fft = win_length if n_fft is None else n_fft
    hop = hop_length
    cutoff = n_fft // 2 + 1
    cutoff_pad = _round_up(cutoff, 128)            # lane-aligned real/imag halves
    n_mels_blk = _round_up(n_mel_channels, 8)      # output sublane dim (no 128 pad)
    R = -(-n_fft // hop)                           # ceil(n_fft / hop) taps per frame
    k_ext = R * hop                                # frame-matrix width (>= n_fft)

    B, T = audio.shape
    pad = n_fft // 2
    padded = jnp.pad(audio, ((0, 0), (pad, pad)), mode="reflect")  # as STFT.transform
    L = T + 2 * pad
    n_frames = (L - n_fft) // hop + 1

    in_dtype = jnp.bfloat16 if use_bf16 else jnp.float32
    w_dtype = in_dtype
    out_dtype = jnp.float16 if is_half else jnp.float32
    in_bytes = jnp.dtype(in_dtype).itemsize
    w_bytes = jnp.dtype(w_dtype).itemsize
    out_bytes = jnp.dtype(out_dtype).itemsize

    def vmem_estimate(tf):
        cr = _round_up(tf + R - 1, 8)
        return (2 * cr * hop * in_bytes                 # chunk tile (double-buffered)
                + tf * k_ext * in_bytes                 # frame-matrix scratch
                + k_ext * 2 * cutoff_pad * w_bytes      # Fourier basis (resident)
                + n_mels_blk * cutoff_pad * w_bytes     # mel basis (resident)
                + 2 * n_mels_blk * tf * out_bytes       # output tile (double-buffered)
                + tf * 2 * cutoff_pad * 4               # STFT result (f32)
                + tf * cutoff_pad * 8)                  # magnitude + relayout slack

    # Frame-tile selection: large enough to amortize the ~0.35 us per-step overhead,
    # bounded by a v7x-safe VMEM budget (64 MiB physical), capped near n_frames.
    if frame_tile is not None:
        TF = max(128, _round_up(int(frame_tile), 128))
    else:
        budget = 40 * 1024 * 1024
        TF = 128
        for cand in (1024, 512, 256):
            if vmem_estimate(cand) <= budget:
                TF = cand
                break
        TF = min(TF, _round_up(n_frames, 128))
        if B == 1:                                  # keep >= 2 grid steps for v7x's 2 TCs
            while TF > 128 and _round_up(n_frames, TF) // TF < 2:
                TF = max(128, _round_up(TF // 2, 128))
    n_frames_pad = _round_up(n_frames, TF)
    n_tiles = n_frames_pad // TF

    # Hop-block regrouping (no unfold): blocks[b, m, :] = padded[b, m*hop:(m+1)*hop].
    CR = _round_up(TF + R - 1, 8)                   # hop-blocks per frame tile
    NB = (n_tiles - 1) * TF + CR
    need = NB * hop
    padded = padded.astype(in_dtype)                # bf16 halves gather + DMA traffic
    if L >= need:
        padded = padded[:, :need]
    else:
        padded = jnp.pad(padded, ((0, 0), (0, need - L)))
    blocks = padded.reshape(B, NB, hop)
    # Per-tile (slightly overlapping) chunks; duplication is only (CR-TF)/TF.
    # TODO(synk): express the overlapping window via element-offset BlockSpec indexing
    # or an in-kernel DMA to drop this host-side gather pass over the audio.
    tile_idx = (np.arange(n_tiles, dtype=np.int32)[:, None] * TF
                + np.arange(CR, dtype=np.int32)[None, :])
    chunks = blocks[:, tile_idx, :]                 # (B, n_tiles, CR, hop)

    # Weights: Fourier basis transposed + zero-padded to (k_ext, 2*cutoff_pad);
    # real part in columns [0:cutoff), imag in [cutoff_pad:cutoff_pad+cutoff).
    fwd = stft_forward_basis(n_fft, win_length)     # (2*cutoff, n_fft)
    W = np.zeros((k_ext, 2 * cutoff_pad), np.float32)
    W[:n_fft, :cutoff] = fwd[:cutoff].T
    W[:n_fft, cutoff_pad:cutoff_pad + cutoff] = fwd[cutoff:].T

    melb = mel_filterbank(sampling_rate, n_fft, n_mel_channels, mel_fmin, mel_fmax)
    MB = np.zeros((n_mels_blk, cutoff_pad), np.float32)
    MB[:n_mel_channels, :cutoff] = melb

    W_d = jnp.asarray(W, dtype=w_dtype)
    MB_d = jnp.asarray(MB, dtype=w_dtype)

    kern = functools.partial(
        _mel_kernel, n_taps=R, tile_frames=TF, hop=hop, cutoff_pad=cutoff_pad,
        clamp=clamp, is_half=is_half)

    flops = 2 * B * n_frames_pad * (k_ext * 2 * cutoff_pad + cutoff_pad * n_mels_blk)
    transcendentals = B * n_frames_pad * (cutoff_pad + n_mels_blk)
    bytes_accessed = (int(chunks.size) * in_bytes + int(W_d.size) * w_bytes
                      + int(MB_d.size) * w_bytes
                      + B * n_mels_blk * n_frames_pad * out_bytes)

    est = vmem_estimate(TF)
    vmem_limit = int(min(56 * 1024 * 1024,
                         max(32 * 1024 * 1024, int(est * 1.5) + 4 * 1024 * 1024)))

    def call(single_buffer_weights):
        def const_spec(shape):
            idx = lambda b, t: (0,) * len(shape)
            if single_buffer_weights:
                # Constant index_map -> weights stay VMEM-resident; single-buffer them.
                return pl.BlockSpec(shape, idx, pipeline_mode=pl.Buffered(1))
            return pl.BlockSpec(shape, idx)

        return pl.pallas_call(
            kern,
            out_shape=jax.ShapeDtypeStruct((B, n_mels_blk, n_frames_pad), out_dtype),
            grid=(B, n_tiles),
            in_specs=[
                # per-(batch, tile) audio chunk; last two dims == full array dims
                pl.BlockSpec((None, None, CR, hop), lambda b, t: (b, t, 0, 0)),
                const_spec((k_ext, 2 * cutoff_pad)),
                const_spec((n_mels_blk, cutoff_pad)),
            ],
            # transposed output: sublane = n_mels (mult. of 8), lane = TF (mult. of 128)
            out_specs=pl.BlockSpec((None, n_mels_blk, TF), lambda b, t: (b, 0, t)),
            scratch_shapes=[pltpu.VMEM((TF, k_ext), in_dtype)],
            compiler_params=pltpu.CompilerParams(
                dimension_semantics=("parallel", "parallel"),
                vmem_limit_bytes=vmem_limit),
            cost_estimate=pl.CostEstimate(
                flops=int(flops), transcendentals=int(transcendentals),
                bytes_accessed=int(bytes_accessed)),
        )(chunks, W_d, MB_d)

    try:
        out_padded = call(True)
    except Exception:   # this jax lacks BlockSpec.pipeline_mode / Buffered(1); fall back
        out_padded = call(False)

    # Already (B, n_mels, n_frames)-oriented: trim padding only (no transpose pass).
    return out_padded[:, :n_mel_channels, :n_frames]


# ----------------------------------------------------------------------------
# Pure-JAX reference (matches the torch module's math) for correctness checks.
# ----------------------------------------------------------------------------
def mel_spectrogram_ref(audio, *, n_mel_channels, sampling_rate, win_length,
                        hop_length, n_fft=None, mel_fmin=0.0, mel_fmax=None,
                        clamp=1e-5, is_half=False):
    n_fft = win_length if n_fft is None else n_fft
    cutoff = n_fft // 2 + 1
    fwd = jnp.asarray(stft_forward_basis(n_fft, win_length))
    melb = jnp.asarray(mel_filterbank(sampling_rate, n_fft, n_mel_channels,
                                      mel_fmin, mel_fmax))
    B, T = audio.shape
    pad = n_fft // 2
    padded = jnp.pad(audio, ((0, 0), (pad, pad)), mode="reflect")
    n_frames = (T + 2 * pad - n_fft) // hop_length + 1
    idx = (np.arange(n_frames, dtype=np.int32)[:, None] * hop_length
           + np.arange(n_fft, dtype=np.int32)[None, :])
    frames = jnp.transpose(padded[:, idx], (0, 2, 1))        # (B, n_fft, n_frames)
    ft = jnp.einsum("fk,bkt->bft", fwd, frames)
    mag = jnp.sqrt(ft[:, :cutoff] ** 2 + ft[:, cutoff:] ** 2)
    mel = jnp.einsum("mf,bft->bmt", melb, mag)
    if is_half:
        mel = mel.astype(jnp.float16)
    return jnp.log(jnp.maximum(mel, jnp.asarray(clamp, mel.dtype)))


if __name__ == "__main__":
    cfg = dict(
        n_mel_channels=16,
        sampling_rate=16000,
        win_length=128,
        hop_length=32,
        n_fft=None,
        mel_fmin=0.0,
        mel_fmax=None,
        clamp=1e-5,
        is_half=False,
    )
    key = jax.random.PRNGKey(0)
    k1, k2 = jax.random.split(key)
    audio = jax.random.normal(k1, (2, 256), dtype=jnp.float32)
    audio2 = jax.random.normal(k2, (2, 8288), dtype=jnp.float32)

    # 1) f32 path: exact structural check against the pure-JAX reference.
    out_f32 = jax.block_until_ready(mel_spectrogram(audio, use_bf16=False, **cfg))
    ref = jax.block_until_ready(mel_spectrogram_ref(audio, **cfg))
    assert out_f32.shape == ref.shape, (out_f32.shape, ref.shape)
    np.testing.assert_allclose(np.asarray(out_f32), np.asarray(ref),
                               rtol=2e-4, atol=2e-4)

    # 2) Default bf16-MXU path.  Compared in the (clamped) mel domain: near the
    #    1e-5 clamp the log amplifies bf16 input-quantization noise without bound,
    #    so log-domain rtol is not meaningful there; the f32 run above already
    #    checks the log itself exactly.
    out_bf16 = jax.block_until_ready(mel_spectrogram(audio, **cfg))
    assert out_bf16.shape == ref.shape, (out_bf16.shape, ref.shape)
    np.testing.assert_allclose(np.exp(np.asarray(out_bf16)), np.exp(np.asarray(ref)),
                               rtol=5e-2, atol=1e-3)

    # 3) Longer audio -> larger frame tile / padded-frame path (bf16 default).
    out2 = jax.block_until_ready(mel_spectrogram(audio2, **cfg))
    ref2 = jax.block_until_ready(mel_spectrogram_ref(audio2, **cfg))
    assert out2.shape == ref2.shape, (out2.shape, ref2.shape)
    np.testing.assert_allclose(np.exp(np.asarray(out2)), np.exp(np.asarray(ref2)),
                               rtol=5e-2, atol=1e-3)

    print("KERNEL_OK")
</pallas_src>

<mosaic_0001>
module attributes {stable_mosaic.version = 11 : i64} {
  func.func @_mel_kernel(%arg0: i32, %arg1: i32, %arg2: memref<1x1x136x32xf32, #tpu.memory_space<vmem>>, %arg3: memref<128x256xf32, #tpu.memory_space<vmem>>, %arg4: memref<16x128xf32, #tpu.memory_space<vmem>>, %arg5: memref<1x16x128xf32, #tpu.memory_space<vmem>>, %arg6: memref<128x128xf32, #tpu.memory_space<vmem>>) attributes {dimension_semantics = [#tpu.dimension_semantics<parallel>, #tpu.dimension_semantics<parallel>], iteration_bounds = array<i64: 2, 1>, scalar_prefetch = 0 : i64, scratch_operands = 1 : i64, tpu.core_type = #tpu.core_type<tc>, window_params = [{transform_indices = @transform_0, window_bounds = array<i64: 1, 1, 136, 32>}, {pipeline_mode = #tpu.pipeline_mode<synchronous>, transform_indices = @transform_1, window_bounds = array<i64: 128, 256>}, {pipeline_mode = #tpu.pipeline_mode<synchronous>, transform_indices = @transform_2, window_bounds = array<i64: 16, 128>}, {transform_indices = @transform_3, window_bounds = array<i64: 1, 16, 128>}]} {
    %c0 = arith.constant 0 : index
    %c0_0 = arith.constant 0 : index
    %c0_1 = arith.constant 0 : index
    %c0_2 = arith.constant 0 : index
    %0 = vector.load %arg2[%c0, %c0_0, %c0_1, %c0_2] : memref<1x1x136x32xf32, #tpu.memory_space<vmem>>, vector<1x1x128x32xf32>
    %1 = vector.shape_cast %0 : vector<1x1x128x32xf32> to vector<128x32xf32>
    %c0_3 = arith.constant 0 : index
    %c0_4 = arith.constant 0 : index
    %2 = vector.load %arg6[%c0_3, %c0_4] : memref<128x128xf32, #tpu.memory_space<vmem>>, vector<128x32xf32>
    tpu.vector_store %arg6[%c0_3, %c0_4], %1 {strides = array<i32>} : memref<128x128xf32, #tpu.memory_space<vmem>>, vector<128x32xf32>,
    %c0_5 = arith.constant 0 : index
    %c0_6 = arith.constant 0 : index
    %c1 = arith.constant 1 : index
    %c0_7 = arith.constant 0 : index
    %3 = vector.load %arg2[%c0_5, %c0_6, %c1, %c0_7] : memref<1x1x136x32xf32, #tpu.memory_space<vmem>>, vector<1x1x128x32xf32>
    %4 = vector.shape_cast %3 : vector<1x1x128x32xf32> to vector<128x32xf32>
    %c0_8 = arith.constant 0 : index
    %c32 = arith.constant 32 : index
    %5 = vector.load %arg6[%c0_8, %c32] : memref<128x128xf32, #tpu.memory_space<vmem>>, vector<128x32xf32>
    tpu.vector_store %arg6[%c0_8, %c32], %4 {strides = array<i32>} : memref<128x128xf32, #tpu.memory_space<vmem>>, vector<128x32xf32>,
    %c0_9 = arith.constant 0 : index
    %c0_10 = arith.constant 0 : index
    %c2 = arith.constant 2 : index
    %c0_11 = arith.constant 0 : index
    %6 = vector.load %arg2[%c0_9, %c0_10, %c2, %c0_11] : memref<1x1x136x32xf32, #tpu.memory_space<vmem>>, vector<1x1x128x32xf32>
    %7 = vector.shape_cast %6 : vector<1x1x128x32xf32> to vector<128x32xf32>
    %c0_12 = arith.constant 0 : index
    %c64 = arith.constant 64 : index
    %8 = vector.load %arg6[%c0_12, %c64] : memref<128x128xf32, #tpu.memory_space<vmem>>, vector<128x32xf32>
    tpu.vector_store %arg6[%c0_12, %c64], %7 {strides = array<i32>} : memref<128x128xf32, #tpu.memory_space<vmem>>, vector<128x32xf32>,
    %c0_13 = arith.constant 0 : index
    %c0_14 = arith.constant 0 : index
    %c3 = arith.constant 3 : index
    %c0_15 = arith.constant 0 : index
    %9 = vector.load %arg2[%c0_13, %c0_14, %c3, %c0_15] : memref<1x1x136x32xf32, #tpu.memory_space<vmem>>, vector<1x1x128x32xf32>
    %10 = vector.shape_cast %9 : vector<1x1x128x32xf32> to vector<128x32xf32>
    %c0_16 = arith.constant 0 : index
    %c96 = arith.constant 96 : index
    %11 = vector.load %arg6[%c0_16, %c96] : memref<128x128xf32, #tpu.memory_space<vmem>>, vector<128x32xf32>
    tpu.vector_store %arg6[%c0_16, %c96], %10 {strides = array<i32>} : memref<128x128xf32, #tpu.memory_space<vmem>>, vector<128x32xf32>,
    %c0_17 = arith.constant 0 : index
    %c0_18 = arith.constant 0 : index
    %12 = vector.load %arg6[%c0_17, %c0_18] : memref<128x128xf32, #tpu.memory_space<vmem>>, vector<128x128xf32>
    %c0_19 = arith.constant 0 : index
    %c0_20 = arith.constant 0 : index
    %13 = vector.load %arg3[%c0_19, %c0_20] : memref<128x256xf32, #tpu.memory_space<vmem>>, vector<128x256xf32>
    %cst = arith.constant dense<0.000000e+00> : vector<128x256xf32>
    %14 = tpu.matmul %12, %13, %cst {dimension_numbers = #tpu.dot_dimension_numbers<[1], [0], [0], [1], [0, 0, 1, 1], [], []>} : vector<128x128xf32>, vector<128x256xf32>, vector<128x256xf32> -> vector<128x256xf32>
    %15 = vector.extract_strided_slice %14 {offsets = [0, 0], sizes = [128, 128], strides = [1, 1]} : vector<128x256xf32> to vector<128x128xf32>
    %16 = vector.extract_strided_slice %14 {offsets = [0, 128], sizes = [128, 128], strides = [1, 1]} : vector<128x256xf32> to vector<128x128xf32>
    %17 = arith.mulf %15, %15 : vector<128x128xf32>
    %18 = arith.mulf %16, %16 : vector<128x128xf32>
    %19 = arith.addf %17, %18 : vector<128x128xf32>
    %20 = math.sqrt %19 : vector<128x128xf32>
    %c0_21 = arith.constant 0 : index
    %c0_22 = arith.constant 0 : index
    %21 = vector.load %arg4[%c0_21, %c0_22] : memref<16x128xf32, #tpu.memory_space<vmem>>, vector<16x128xf32>
    %cst_23 = arith.constant dense<0.000000e+00> : vector<16x128xf32>
    %22 = tpu.matmul %21, %20, %cst_23 {dimension_numbers = #tpu.dot_dimension_numbers<[1], [1], [0], [0], [0, 0, 1, 0], [], []>} : vector<16x128xf32>, vector<128x128xf32>, vector<16x128xf32> -> vector<16x128xf32>
    %cst_24 = arith.constant 9.99999974E-6 : f32
    %23 = vector.broadcast %cst_24 : f32 to vector<16x128xf32>
    %24 = arith.maximumf %22, %23 : vector<16x128xf32>
    %25 = math.log %24 : vector<16x128xf32>
    %c0_25 = arith.constant 0 : index
    %c0_26 = arith.constant 0 : index
    %c0_27 = arith.constant 0 : index
    %26 = vector.load %arg5[%c0_25, %c0_26, %c0_27] : memref<1x16x128xf32, #tpu.memory_space<vmem>>, vector<1x16x128xf32>
    %27 = vector.shape_cast %26 : vector<1x16x128xf32> to vector<16x128xf32>
    %28 = vector.shape_cast %25 : vector<16x128xf32> to vector<1x16x128xf32>
    tpu.vector_store %arg5[%c0_25, %c0_26, %c0_27], %28 {strides = array<i32>} : memref<1x16x128xf32, #tpu.memory_space<vmem>>, vector<1x16x128xf32>,
    return
  }
  func.func @transform_0(%arg0: i32, %arg1: i32) -> (i32, i32, i32, i32) {
    %c0_i32 = arith.constant 0 : i32
    %c0_i32_0 = arith.constant 0 : i32
    %c0_i32_1 = arith.constant 0 : i32
    return %arg0, %arg1, %c0_i32, %c0_i32_0 : i32, i32, i32, i32
  }
  func.func @transform_1(%arg0: i32, %arg1: i32) -> (i32, i32) {
    %c0_i32 = arith.constant 0 : i32
    %c0_i32_0 = arith.constant 0 : i32
    %c0_i32_1 = arith.constant 0 : i32
    return %c0_i32, %c0_i32_0 : i32, i32
  }
  func.func @transform_2(%arg0: i32, %arg1: i32) -> (i32, i32) {
    %c0_i32 = arith.constant 0 : i32
    %c0_i32_0 = arith.constant 0 : i32
    %c0_i32_1 = arith.constant 0 : i32
    return %c0_i32, %c0_i32_0 : i32, i32
  }
  func.func @transform_3(%arg0: i32, %arg1: i32) -> (i32, i32, i32) {
    %c0_i32 = arith.constant 0 : i32
    %c0_i32_0 = arith.constant 0 : i32
    return %arg0, %c0_i32, %arg1 : i32, i32, i32
  }
}

module attributes {stable_mosaic.version = 11 : i64} {
  func.func @_mel_kernel(%arg0: i32, %arg1: i32, %arg2: memref<1x1x136x32xf32, #tpu.memory_space<vmem>>, %arg3: memref<128x256xf32, #tpu.memory_space<vmem>>, %arg4: memref<16x128xf32, #tpu.memory_space<vmem>>, %arg5: memref<1x16x128xf32, #tpu.memory_space<vmem>>, %arg6: memref<128x128xf32, #tpu.memory_space<vmem>>) attributes {dimension_semantics = [#tpu.dimension_semantics<parallel>, #tpu.dimension_semantics<parallel>], iteration_bounds = array<i64: 2, 1>, scalar_prefetch = 0 : i64, scratch_operands = 1 : i64, tpu.core_type = #tpu.core_type<tc>, window_params = [{transform_indices = @transform_0, window_bounds = array<i64: 1, 1, 136, 32>}, {pipeline_mode = #tpu.pipeline_mode<synchronous>, transform_indices = @transform_1, window_bounds = array<i64: 128, 256>}, {pipeline_mode = #tpu.pipeline_mode<synchronous>, transform_indices = @transform_2, window_bounds = array<i64: 16, 128>}, {transform_indices = @transform_3, window_bounds = array<i64: 1, 16, 128>}]} {
    %c0 = arith.constant 0 : index
    %c0_0 = arith.constant 0 : index
    %c0_1 = arith.constant 0 : index
    %c0_2 = arith.constant 0 : index
    %0 = vector.load %arg2[%c0, %c0_0, %c0_1, %c0_2] : memref<1x1x136x32xf32, #tpu.memory_space<vmem>>, vector<1x1x128x32xf32>
    %1 = vector.shape_cast %0 : vector<1x1x128x32xf32> to vector<128x32xf32>
    %c0_3 = arith.constant 0 : index
    %c0_4 = arith.constant 0 : index
    %2 = vector.load %arg6[%c0_3, %c0_4] : memref<128x128xf32, #tpu.memory_space<vmem>>, vector<128x32xf32>
    tpu.vector_store %arg6[%c0_3, %c0_4], %1 {strides = array<i32>} : memref<128x128xf32, #tpu.memory_space<vmem>>, vector<128x32xf32>,
    %c0_5 = arith.constant 0 : index
    %c0_6 = arith.constant 0 : index
    %c1 = arith.constant 1 : index
    %c0_7 = arith.constant 0 : index
    %3 = vector.load %arg2[%c0_5, %c0_6, %c1, %c0_7] : memref<1x1x136x32xf32, #tpu.memory_space<vmem>>, vector<1x1x128x32xf32>
    %4 = vector.shape_cast %3 : vector<1x1x128x32xf32> to vector<128x32xf32>
    %c0_8 = arith.constant 0 : index
    %c32 = arith.constant 32 : index
    %5 = vector.load %arg6[%c0_8, %c32] : memref<128x128xf32, #tpu.memory_space<vmem>>, vector<128x32xf32>
    tpu.vector_store %arg6[%c0_8, %c32], %4 {strides = array<i32>} : memref<128x128xf32, #tpu.memory_space<vmem>>, vector<128x32xf32>,
    %c0_9 = arith.constant 0 : index
    %c0_10 = arith.constant 0 : index
    %c2 = arith.constant 2 : index
    %c0_11 = arith.constant 0 : index
    %6 = vector.load %arg2[%c0_9, %c0_10, %c2, %c0_11] : memref<1x1x136x32xf32, #tpu.memory_space<vmem>>, vector<1x1x128x32xf32>
    %7 = vector.shape_cast %6 : vector<1x1x128x32xf32> to vector<128x32xf32>
    %c0_12 = arith.constant 0 : index
    %c64 = arith.constant 64 : index
    %8 = vector.load %arg6[%c0_12, %c64] : memref<128x128xf32, #tpu.memory_space<vmem>>, vector<128x32xf32>
    tpu.vector_store %arg6[%c0_12, %c64], %7 {strides = array<i32>} : memref<128x128xf32, #tpu.memory_space<vmem>>, vector<128x32xf32>,
    %c0_13 = arith.constant 0 : index
    %c0_14 = arith.constant 0 : index
    %c3 = arith.constant 3 : index
    %c0_15 = arith.constant 0 : index
    %9 = vector.load %arg2[%c0_13, %c0_14, %c3, %c0_15] : memref<1x1x136x32xf32, #tpu.memory_space<vmem>>, vector<1x1x128x32xf32>
    %10 = vector.shape_cast %9 : vector<1x1x128x32xf32> to vector<128x32xf32>
    %c0_16 = arith.constant 0 : index
    %c96 = arith.constant 96 : index
    %11 = vector.load %arg6[%c0_16, %c96] : memref<128x128xf32, #tpu.memory_space<vmem>>, vector<128x32xf32>
    tpu.vector_store %arg6[%c0_16, %c96], %10 {strides = array<i32>} : memref<128x128xf32, #tpu.memory_space<vmem>>, vector<128x32xf32>,
    %c0_17 = arith.constant 0 : index
    %c0_18 = arith.constant 0 : index
    %12 = vector.load %arg6[%c0_17, %c0_18] : memref<128x128xf32, #tpu.memory_space<vmem>>, vector<128x128xf32>
    %c0_19 = arith.constant 0 : index
    %c0_20 = arith.constant 0 : index
    %13 = vector.load %arg3[%c0_19, %c0_20] : memref<128x256xf32, #tpu.memory_space<vmem>>, vector<128x256xf32>
    %cst = arith.constant dense<0.000000e+00> : vector<128x256xf32>
    %14 = tpu.matmul %12, %13, %cst {dimension_numbers = #tpu.dot_dimension_numbers<[1], [0], [0], [1], [0, 0, 1, 1], [], []>} : vector<128x128xf32>, vector<128x256xf32>, vector<128x256xf32> -> vector<128x256xf32>
    %15 = vector.extract_strided_slice %14 {offsets = [0, 0], sizes = [128, 128], strides = [1, 1]} : vector<128x256xf32> to vector<128x128xf32>
    %16 = vector.extract_strided_slice %14 {offsets = [0, 128], sizes = [128, 128], strides = [1, 1]} : vector<128x256xf32> to vector<128x128xf32>
    %17 = arith.mulf %15, %15 : vector<128x128xf32>
    %18 = arith.mulf %16, %16 : vector<128x128xf32>
    %19 = arith.addf %17, %18 : vector<128x128xf32>
    %20 = math.sqrt %19 : vector<128x128xf32>
    %c0_21 = arith.constant 0 : index
    %c0_22 = arith.constant 0 : index
    %21 = vector.load %arg4[%c0_21, %c0_22] : memref<16x128xf32, #tpu.memory_space<vmem>>, vector<16x128xf32>
    %cst_23 = arith.constant dense<0.000000e+00> : vector<16x128xf32>
    %22 = tpu.matmul %21, %20, %cst_23 {dimension_numbers = #tpu.dot_dimension_numbers<[1], [1], [0], [0], [0, 0, 1, 0], [], []>} : vector<16x128xf32>, vector<128x128xf32>, vector<16x128xf32> -> vector<16x128xf32>
    %cst_24 = arith.constant 9.99999974E-6 : f32
    %23 = vector.broadcast %cst_24 : f32 to vector<16x128xf32>
    %24 = arith.maximumf %22, %23 : vector<16x128xf32>
    %25 = math.log %24 : vector<16x128xf32>
    %c0_25 = arith.constant 0 : index
    %c0_26 = arith.constant 0 : index
    %c0_27 = arith.constant 0 : index
    %26 = vector.load %arg5[%c0_25, %c0_26, %c0_27] : memref<1x16x128xf32, #tpu.memory_space<vmem>>, vector<1x16x128xf32>
    %27 = vector.shape_cast %26 : vector<1x16x128xf32> to vector<16x128xf32>
    %28 = vector.shape_cast %25 : vector<16x128xf32> to vector<1x16x128xf32>
    tpu.vector_store %arg5[%c0_25, %c0_26, %c0_27], %28 {strides = array<i32>} : memref<1x16x128xf32, #tpu.memory_space<vmem>>, vector<1x16x128xf32>,
    return
  }
  func.func @transform_0(%arg0: i32, %arg1: i32) -> (i32, i32, i32, i32) {
    %c0_i32 = arith.constant 0 : i32
    %c0_i32_0 = arith.constant 0 : i32
    %c0_i32_1 = arith.constant 0 : i32
    return %arg0, %arg1, %c0_i32, %c0_i32_0 : i32, i32, i32, i32
  }
  func.func @transform_1(%arg0: i32, %arg1: i32) -> (i32, i32) {
    %c0_i32 = arith.constant 0 : i32
    %c0_i32_0 = arith.constant 0 : i32
    %c0_i32_1 = arith.constant 0 : i32
    return %c0_i32, %c0_i32_0 : i32, i32
  }
  func.func @transform_2(%arg0: i32, %arg1: i32) -> (i32, i32) {
    %c0_i32 = arith.constant 0 : i32
    %c0_i32_0 = arith.constant 0 : i32
    %c0_i32_1 = arith.constant 0 : i32
    return %c0_i32, %c0_i32_0 : i32, i32
  }
  func.func @transform_3(%arg0: i32, %arg1: i32) -> (i32, i32, i32) {
    %c0_i32 = arith.constant 0 : i32
    %c0_i32_0 = arith.constant 0 : i32
    return %arg0, %c0_i32, %arg1 : i32, i32, i32
  }
}

</mosaic_0001>

<bundles_post_ra>
// kernel: tpu_custom_call.1
= control target key start
LH: loop header
LB: loop body
LE: loop exit
PB: predicated region body
PF: predicated region fallthrough
CT: control target
= control target key end

     0   :  { %8 = vsyncpa [#allocation4], 0  ;;  %s1817_s0 = inlined_call_operand.vmem [shape: f32[2,1,136,32], index: 0, kind: input, shape index: {}]   ;;  %s1818_s1 = inlined_call_operand.vmem [shape: f32[128,256], index: 1, kind: input, shape index: {}]   ;;  %s1819_s2 = inlined_call_operand.vmem [shape: f32[16,128], index: 2, kind: input, shape index: {}]   ;;  %s1820_s3 = inlined_call_operand.hbm [shape: f32[2,16,128], index: 3, kind: output, shape index: {}]  }
   0x1   :  { %10 = vsyncpa [#allocation4 + $0x1], 0  ;;  %s1406_s12 = smov 0   ;;  %s1408_s13 = smov 0  }
   0x2   :  { %s1410_s14 = smov 0   ;;  %s1412_s15 = smov 0  }
   0x3   :  { %s1414_s16 = smov 0   ;;  %s1416_s17 = smov 0  }
   0x4 LB: > { %s1071_s18 = sadd.s32 4294967295, %s1377_s17   ;;  %s1072_s19 = sadd.s32 4294967294, %s1377_s17   ;;  %s1377_s17 = sphi %s1416_s17, %s16_s17   ;;  %s1373_s16 = sphi %s1414_s16, %s1827_s16   ;;  %s1369_s15 = sphi %s1412_s15, %s1826_s15   ;;  %s1365_s14 = sphi %s1410_s14, %s1825_s14   ;;  %s1361_s13 = sphi %s1408_s13, %s1824_s13   ;;  %s1357_s12 = sphi %s1406_s12, %s1823_s12  }
   0x5   : > { %s28_s20 = sadd.s32 1, %s1373_s16  ;;  %s107_s21 = sadd.s32 1, %s1365_s14 }
   0x6   : > { %p30_p0 = scmp.ge.s32.totalorder %s28_s20, 2  ;;  %p117_p1 = scmp.ne.s32.totalorder %s1365_s14, %s1361_s13 }
   0x7   : > { %p118_p2 = scmp.eq.s32.totalorder %s1071_s18, 1  ;;  %p123_p3 = scmp.ne.s32.totalorder %s1361_s13, %s1357_s12 }
   0x8   : > { %s1829_s20 = smov (%p30_p0, %s28_s20), 0  ;;  %p124_p5 = scmp.eq.s32.totalorder %s1072_s19, 1 }
   0x9   : > { %p1446_p4 = por %p118_p2, %p117_p1  ;;  %s102_s23 = ssub.s32 %s1373_s16, %s1829_s20 }
   0xa   : > { %p1075_p6 = scmp.ge.s32.totalorder %s1377_s17, 1  ;;  %p105_p7 = scmp.eq.s32.totalorder %s102_s23, 0 }
   0xb   : > { %p1453_p8 = por %p124_p5, %p123_p3  ;;  %p160_p9 = scmp.lt.s32.totalorder %s1377_s17, 3 }
   0xc   : > { %s1459_s25 = scalar_select %p105_p7, %s1365_s14, %s107_s21  }
   0xd   : > { %p161_p10 = pnand %p1075_p6, %p160_p9 }
   0xe   : > { %p188_p11 = scmp.lt.s32.totalorder (!%p161_p10), %s1369_s15, 1  ;;  %v538_v0 = vld [vmem:[%s1818_s1 + $0x8] sm:$0xff] (!%p161_p10)  ;;  %v540_v1 = vld [vmem:[%s1818_s1 + $0x18] sm:$0xff] (!%p161_p10)  ;;  %v537_v2 = vld [vmem:[%s1818_s1] sm:$0xff] (!%p161_p10)  ;;  %v1379_v21 = vmov (!%p161_p10), 0.0   ;;  %s1380_s23 = smov (!%p161_p10), 32  }
   0xf   : > { %164 = sbr.rel (%p161_p10) target bundleno = 729 (0x2d9), region = 32  ;;  %v1137_v3 = vpack.c.bf16 (!%p161_p10), %v540_v1, %v538_v0  ;;  %v539_v4 = vld [vmem:[%s1818_s1 + $0x10] sm:$0xff] (!%p161_p10)  ;;  %v542_v5 = vld [vmem:[%s1818_s1 + $0x28] sm:$0xff] (!%p161_p10)  ;;  %v544_v6 = vld [vmem:[%s1818_s1 + $0x38] sm:$0xff] (!%p161_p10)  ;;  %633 = vmatprep.mubr.f32.mxu0 (!%p161_p10), %v1379_v21  ;;  %s1381_s26 = smov (!%p161_p10), 96   ;;  %vm213_vm0 = vcmask (!%p161_p10), 261120  }
  0x10   : > { %v1139_v7 = vpack.c.bf16 (!%p161_p10), %v539_v4, %v537_v2  ;;  %v1141_v8 = vpack.c.bf16 (!%p161_p10), %v544_v6, %v542_v5  ;;  %v541_v9 = vld [vmem:[%s1818_s1 + $0x20] sm:$0xff] (!%p161_p10)  ;;  %v543_v10 = vld [vmem:[%s1818_s1 + $0x30] sm:$0xff] (!%p161_p10)  ;;  %v546_v11 = vld [vmem:[%s1818_s1 + $0x48] sm:$0xff] (!%p161_p10)  ;;  %s1382_s9 = smov (!%p161_p10), 64   ;;  %vm310_vm1 = vcmask (!%p161_p10), 523520   ;;  %vm407_vm2 = vcmask (!%p161_p10), 785920  }
  0x11   : > { %1138 = vmatprep.subr.bf16.mxu0 (!%p161_p10), %v1137_v3  ;;  %v548_v12 = vld [vmem:[%s1818_s1 + $0x58] sm:$0xff] (!%p161_p10)  ;;  %v1143_v13 = vpack.c.bf16 (!%p161_p10), %v543_v10, %v541_v9  ;;  %v545_v15 = vld [vmem:[%s1818_s1 + $0x40] sm:$0xff] (!%p161_p10)  ;;  %v547_v16 = vld [vmem:[%s1818_s1 + $0x50] sm:$0xff] (!%p161_p10)  ;;  %vm504_vm3 = vcmask (!%p161_p10), 1048320   ;;  %s185_s18 = sand.u32 (!%p161_p10), 1, %s1361_s13   ;;  %s1083_s28 = sshll.u32 (!%p161_p10), %s1369_s15, 8 }
  0x12   : > { %1140 = vmatpush1.bf16.msra.mxu0 (!%p161_p10), %v1139_v7  ;;  %v1145_v14 = vpack.c.bf16 (!%p161_p10), %v548_v12, %v546_v11  ;;  %v550_v17 = vld [vmem:[%s1818_s1 + $0x68] sm:$0xff] (!%p161_p10)  ;;  %v552_v20 = vld [vmem:[%s1818_s1 + $0x78] sm:$0xff] (!%p161_p10)  ;;  %v1147_v24 = vpack.c.bf16 (!%p161_p10), %v547_v16, %v545_v15  ;;  %v549_v26 = vld [vmem:[%s1818_s1 + $0x60] sm:$0xff] (!%p161_p10)  ;;  %s1076_s19 = sshll.u32 (!%p161_p10), %s185_s18, 4  ;;  %s1769_s4 = scalar_lea.hbm (!%p161_p10), %s1820_s3, %s1083_s28 }
  0x13   : > { %1142 = vmatprep.subr.bf16.mxu0 (!%p161_p10), %v1141_v8  ;;  %v1149_v25 = vpack.c.bf16 (!%p161_p10), %v552_v20, %v550_v17  ;;  %v551_v27 = vld [vmem:[%s1818_s1 + $0x70] sm:$0xff] (!%p161_p10)  ;;  %v554_v28 = vld [vmem:[%s1818_s1 + $0x88] sm:$0xff] (!%p161_p10)  ;;  %v556_v29 = vld [vmem:[%s1818_s1 + $0x98] sm:$0xff] (!%p161_p10)  ;;  %s187_s21 = scalar_lea.vmem (!%p161_p10), [#allocation3], %s1076_s19  ;;  %s1771_s5 = scalar_lea.sflag (!%p161_p10), [#allocation4], %s185_s18 }
  0x14   : > { %v1151_v32 = vpack.c.bf16 (!%p161_p10), %v551_v27, %v549_v26  ;;  %v1153_v33 = vpack.c.bf16 (!%p161_p10), %v556_v29, %v554_v28  ;;  %v553_v34 = vld [vmem:[%s1818_s1 + $0x80] sm:$0xff] (!%p161_p10)  ;;  %v555_v35 = vld [vmem:[%s1818_s1 + $0x90] sm:$0xff] (!%p161_p10)  ;;  %v558_v42 = vld [vmem:[%s1818_s1 + $0xa8] sm:$0xff] (!%p161_p10)  ;;  %s990_s27 = sshll.u32 (!%p161_p10), %s187_s21, 4  ;;  %s1764_s27 = int_to_ptr.vmem [resolvable:$true] %s990_s27 }
  0x15   : > { %v1155_v38 = vpack.c.bf16 (!%p161_p10), %v555_v35, %v553_v34  ;;  %v560_v45 = vld [vmem:[%s1818_s1 + $0xb8] sm:$0xff] (!%p161_p10)  ;;  %v557_v46 = vld [vmem:[%s1818_s1 + $0xa0] sm:$0xff] (!%p161_p10)  ;;  %v559_v47 = vld [vmem:[%s1818_s1 + $0xb0] sm:$0xff] (!%p161_p10)  ;;  %s1299_s7 = scalar_lea.vmem (!%p161_p10), %s1764_s27, 256 }
  0x16   : > { %s189_s11 = scalar_select %p188_p11, %s1369_s15, 1  ;;  %1144 = vmatpush1.bf16.msra.mxu0 %v1143_v13  ;;  %v1157_v48 = vpack.c.bf16 %v560_v45, %v558_v42  ;;  %v1159_v49 = vpack.c.bf16 %v559_v47, %v557_v46  ;;  %v562_v51 = vld [vmem:[%s1818_s1 + $0xc8] sm:$0xff]  ;;  %v564_v52 = vld [vmem:[%s1818_s1 + $0xd8] sm:$0xff]  ;;  %v561_v55 = vld [vmem:[%s1818_s1 + $0xc0] sm:$0xff] }
  0x17   : > { %1146 = vmatprep.subr.bf16.mxu0 %v1145_v14  ;;  %v1161_v54 = vpack.c.bf16 %v564_v52, %v562_v51  ;;  %v563_v56 = vld [vmem:[%s1818_s1 + $0xd0] sm:$0xff]  ;;  %v566_v57 = vld [vmem:[%s1818_s1 + $0xe8] sm:$0xff]  ;;  %v568_v58 = vld [vmem:[%s1818_s1 + $0xf8] sm:$0xff]  ;;  %p1300_p12 = scmp.ne.s32.totalorder %s1764_s27, %s1299_s7  ;;  %s1383_s15 = smov [#allocation3]  }
  0x18   : > { %s1201_s30 = smul.u32 136, %s189_s11  ;;  %v1163_v62 = vpack.c.bf16 %v563_v56, %v561_v55  ;;  %v1165_v2 = vpack.c.bf16 %v568_v58, %v566_v57  ;;  %v565_v3 = vld [vmem:[%s1818_s1 + $0xe0] sm:$0xff]  ;;  %v567_v4 = vld [vmem:[%s1818_s1 + $0xf0] sm:$0xff]  ;;  %s1303_s8 = sshll.u32 %s1383_s15, 4  ;;  %s1304_s8 = int_to_ptr.vmem [resolvable:$false] %s1303_s8 }
  0x19   : > { %v1167_v7 = vpack.c.bf16 %v567_v4, %v565_v3  ;;  %p1301_p13 = pnand %p1300_p12, %p1446_p4  ;;  %s1305_s10 = scalar_lea.vmem %s1304_s8, 512 }
  0x1a   : > { %s1496_s6 = scalar_lea.vmem %s1817_s0, %s1201_s30  ;;  %1148 = vmatpush1.bf16.msra.mxu0 %v1147_v24  ;;  %p1306_p1 = scmp.lt.s32.totalorder %s1764_s27, %s1304_s8 }
  0x1b   : > { %v230_v18 = vld [vmem:[%s1496_s6 + $0x1] sm:$0xff]  ;;  %v231_v23 = vld [vmem:[%s1496_s6 + $0x9] sm:$0xff]  ;;  %1150 = vmatprep.subr.bf16.mxu0 %v1149_v25  ;;  %v232_v36 = vld [vmem:[%s1496_s6 + $0x11] sm:$0xff]  ;;  %p1302_p0 = pneg %p1301_p13  ;;  %p1307_p2 = scmp.lt.s32.totalorder %s1305_s10, %s1299_s7 }
  0x1c   : > { %v424_v19 = vld [vmem:[%s1496_s6 + $0x3] sm:$0xff]  ;;  %262 = vrot.lane.b32.xlu0 %v230_v18, %s1380_s23  ;;  %v425_v31 = vld [vmem:[%s1496_s6 + $0xb] sm:$0xff]  ;;  %v426_v39 = vld [vmem:[%s1496_s6 + $0x13] sm:$0xff] }
  0x1d   : > { %456 = vrot.lane.b32.xlu1 %v424_v19, %s1381_s26  ;;  %v327_v22 = vld [vmem:[%s1496_s6 + $0x2] sm:$0xff]  ;;  %v328_v30 = vld [vmem:[%s1496_s6 + $0xa] sm:$0xff]  ;;  %v329_v37 = vld [vmem:[%s1496_s6 + $0x12] sm:$0xff]  ;;  %p1308_p3 = por %p1307_p2, %p1306_p1 }
  0x1e   : > { %1152 = vmatpush1.bf16.msra.mxu0 %v1151_v32  ;;  %v233_v40 = vld [vmem:[%s1496_s6 + $0x19] sm:$0xff]  ;;  %v198_v50 = vld [vmem:[%s1496_s6 + $0x8] sm:$0xff]  ;;  %v199_v60 = vld [vmem:[%s1496_s6 + $0x10] sm:$0xff] }
  0x1f   : > { %1154 = vmatprep.subr.bf16.mxu0 %v1153_v33  ;;  %v330_v41 = vld [vmem:[%s1496_s6 + $0x1a] sm:$0xff]  ;;  %215 = vst.msk [vmem:[#allocation2 + $0x8] sm:$0xff] %vm213_vm0, %v198_v50  ;;  %v331_v59 = vld [vmem:[%s1496_s6 + $0x22] sm:$0xff]  ;;  %216 = vst.msk [vmem:[#allocation2 + $0x10] sm:$0xff] %vm213_vm0, %v199_v60  ;;  %p1309_p5 = pnand %p1308_p3, %p1302_p0 }
  0x20   : > { %359 = vrot.lane.b32.xlu0 %v327_v22, %s1382_s9  ;;  %v427_v43 = vld [vmem:[%s1496_s6 + $0x1b] sm:$0xff]  ;;  %v202_v0 = vld [vmem:[%s1496_s6 + $0x28] sm:$0xff]  ;;  %v203_v1 = vld [vmem:[%s1496_s6 + $0x30] sm:$0xff] }
  0x21   : > { %264 = vrot.lane.b32.xlu1 %v231_v23, %s1380_s23  ;;  %v197_v44 = vld [vmem:[%s1496_s6] sm:$0xff]  ;;  %v200_v61 = vld [vmem:[%s1496_s6 + $0x18] sm:$0xff]  ;;  %219 = vst.msk [vmem:[#allocation2 + $0x28] sm:$0xff] %vm213_vm0, %v202_v0  ;;  %220 = vst.msk [vmem:[#allocation2 + $0x30] sm:$0xff] %vm213_vm0, %v203_v1 }
  0x22   : > { %1156 = vmatpush1.bf16.msra.mxu0 %v1155_v38  ;;  %214 = vst.msk [vmem:[#allocation2] sm:$0xff] %vm213_vm0, %v197_v44  ;;  %v234_v53 = vld [vmem:[%s1496_s6 + $0x21] sm:$0xff]  ;;  %217 = vst.msk [vmem:[#allocation2 + $0x18] sm:$0xff] %vm213_vm0, %v200_v61  ;;  %v235_v6 = vld [vmem:[%s1496_s6 + $0x29] sm:$0xff] }
  0x23   : > { %1158 = vmatprep.subr.bf16.mxu0 %v1157_v48  ;;  %v201_v63 = vld [vmem:[%s1496_s6 + $0x20] sm:$0xff]  ;;  %v204_v8 = vld [vmem:[%s1496_s6 + $0x38] sm:$0xff]  ;;  %v332_v9 = vld [vmem:[%s1496_s6 + $0x2a] sm:$0xff] }
  0x24   : > { %361 = vrot.lane.b32.xlu0 %v328_v30, %s1382_s9  ;;  %218 = vst.msk [vmem:[#allocation2 + $0x20] sm:$0xff] %vm213_vm0, %v201_v63  ;;  %v428_v5 = vld [vmem:[%s1496_s6 + $0x23] sm:$0xff]  ;;  %221 = vst.msk [vmem:[#allocation2 + $0x38] sm:$0xff] %vm213_vm0, %v204_v8  ;;  %v429_v10 = vld [vmem:[%s1496_s6 + $0x2b] sm:$0xff] }
  0x25   : > { %458 = vrot.lane.b32.xlu1 %v425_v31, %s1381_s26  ;;  %v236_v11 = vld [vmem:[%s1496_s6 + $0x31] sm:$0xff]  ;;  %v205_v13 = vld [vmem:[%s1496_s6 + $0x40] sm:$0xff]  ;;  %v206_v16 = vld [vmem:[%s1496_s6 + $0x48] sm:$0xff] }
  0x26   : > { %1160 = vmatpush1.bf16.msra.mxu0 %v1159_v49  ;;  %v333_v12 = vld [vmem:[%s1496_s6 + $0x32] sm:$0xff]  ;;  %222 = vst.msk [vmem:[#allocation2 + $0x40] sm:$0xff] %vm213_vm0, %v205_v13  ;;  %223 = vst.msk [vmem:[#allocation2 + $0x48] sm:$0xff] %vm213_vm0, %v206_v16  ;;  %v334_v17 = vld [vmem:[%s1496_s6 + $0x3a] sm:$0xff] }
  0x27   : > { %1162 = vmatprep.subr.bf16.mxu0 %v1161_v54  ;;  %v430_v14 = vld [vmem:[%s1496_s6 + $0x33] sm:$0xff]  ;;  %v431_v18 = vld [vmem:[%s1496_s6 + $0x3b] sm:$0xff]  ;;  %v432_v23 = vld [vmem:[%s1496_s6 + $0x43] sm:$0xff] }
  0x28   : > { %266 = vrot.lane.b32.xlu0 %v232_v36, %s1380_s23  ;;  %v237_v15 = vld [vmem:[%s1496_s6 + $0x39] sm:$0xff]  ;;  %v238_v19 = vld [vmem:[%s1496_s6 + $0x41] sm:$0xff]  ;;  %v207_v22 = vld [vmem:[%s1496_s6 + $0x50] sm:$0xff] }
  0x29   : > { %363 = vrot.lane.b32.xlu1 %v329_v37, %s1382_s9  ;;  %v335_v20 = vld [vmem:[%s1496_s6 + $0x42] sm:$0xff]  ;;  %224 = vst.msk [vmem:[#allocation2 + $0x50] sm:$0xff] %vm213_vm0, %v207_v22  ;;  %v208_v25 = vld [vmem:[%s1496_s6 + $0x58] sm:$0xff]  ;;  %v336_v26 = vld [vmem:[%s1496_s6 + $0x4a] sm:$0xff] }
  0x2a   : > { %1164 = vmatpush1.bf16.msra.mxu0 %v1163_v62  ;;  %v239_v24 = vld [vmem:[%s1496_s6 + $0x49] sm:$0xff]  ;;  %225 = vst.msk [vmem:[#allocation2 + $0x58] sm:$0xff] %vm213_vm0, %v208_v25  ;;  %v240_v28 = vld [vmem:[%s1496_s6 + $0x51] sm:$0xff]  ;;  %v209_v30 = vld [vmem:[%s1496_s6 + $0x60] sm:$0xff] }
  0x2b   : > { %1166 = vmatprep.subr.bf16.mxu0 %v1165_v2  ;;  %v433_v27 = vld [vmem:[%s1496_s6 + $0x4b] sm:$0xff]  ;;  %226 = vst.msk [vmem:[#allocation2 + $0x60] sm:$0xff] %vm213_vm0, %v209_v30  ;;  %v434_v31 = vld [vmem:[%s1496_s6 + $0x53] sm:$0xff]  ;;  %v435_v35 = vld [vmem:[%s1496_s6 + $0x5b] sm:$0xff] }
  0x2c   : > { %460 = vrot.lane.b32.xlu0 %v426_v39, %s1381_s26  ;;  %v337_v29 = vld [vmem:[%s1496_s6 + $0x52] sm:$0xff]  ;;  %v210_v33 = vld [vmem:[%s1496_s6 + $0x68] sm:$0xff]  ;;  %v338_v34 = vld [vmem:[%s1496_s6 + $0x5a] sm:$0xff] }
  0x2d   : > { %268 = vrot.lane.b32.xlu1 %v233_v40, %s1380_s23  ;;  %v241_v32 = vld [vmem:[%s1496_s6 + $0x59] sm:$0xff]  ;;  %227 = vst.msk [vmem:[#allocation2 + $0x68] sm:$0xff] %vm213_vm0, %v210_v33  ;;  %v242_v36 = vld [vmem:[%s1496_s6 + $0x61] sm:$0xff]  ;;  %v211_v38 = vld [vmem:[%s1496_s6 + $0x70] sm:$0xff] }
  0x2e   : > { %1168 = vmatpush1.bf16.msra.mxu0 %v1167_v7  ;;  %v339_v37 = vld [vmem:[%s1496_s6 + $0x62] sm:$0xff]  ;;  %228 = vst.msk [vmem:[#allocation2 + $0x70] sm:$0xff] %vm213_vm0, %v211_v38  ;;  %v340_v42 = vld [vmem:[%s1496_s6 + $0x6a] sm:$0xff]  ;;  %v341_v45 = vld [vmem:[%s1496_s6 + $0x72] sm:$0xff] }
  0x2f   : > { %v436_v39 = vld [vmem:[%s1496_s6 + $0x63] sm:$0xff]  ;;  %v244_v44 = vld [vmem:[%s1496_s6 + $0x71] sm:$0xff]  ;;  %v245_v47 = vld [vmem:[%s1496_s6 + $0x79] sm:$0xff] }
  0x30   : > { %365 = vrot.lane.b32.xlu0 %v330_v41, %s1382_s9  ;;  %v243_v40 = vld [vmem:[%s1496_s6 + $0x69] sm:$0xff]  ;;  %v212_v41 = vld [vmem:[%s1496_s6 + $0x78] sm:$0xff] }
  0x31   : > { %462 = vrot.lane.b32.xlu1 %v427_v43, %s1381_s26  ;;  %229 = vst.msk [vmem:[#allocation2 + $0x78] sm:$0xff] %vm213_vm0, %v212_v41  ;;  %v437_v43 = vld [vmem:[%s1496_s6 + $0x6b] sm:$0xff]  ;;  %v438_v46 = vld [vmem:[%s1496_s6 + $0x73] sm:$0xff]  ;;  %v439_v49 = vld [vmem:[%s1496_s6 + $0x7b] sm:$0xff] }
  0x32   : > { %v342_v48 = vld [vmem:[%s1496_s6 + $0x7a] sm:$0xff] }
  0x34   : > { %270 = vrot.lane.b32.xlu0 %v234_v53, %s1380_s23 }
  0x35   : > { %367 = vrot.lane.b32.xlu1 %v331_v59, %s1382_s9 }
  0x38   : > { %464 = vrot.lane.b32.xlu0 %v428_v5, %s1381_s26 }
  0x39   : > { %272 = vrot.lane.b32.xlu1 %v235_v6, %s1380_s23 }
  0x3c   : > { %369 = vrot.lane.b32.xlu0 %v332_v9, %s1382_s9 }
  0x3d   : > { %466 = vrot.lane.b32.xlu1 %v429_v10, %s1381_s26 }
  0x40   : > { %274 = vrot.lane.b32.xlu0 %v236_v11, %s1380_s23 }
  0x41   : > { %371 = vrot.lane.b32.xlu1 %v333_v12, %s1382_s9 }
  0x44   : > { %468 = vrot.lane.b32.xlu0 %v430_v14, %s1381_s26 }
  0x45   : > { %276 = vrot.lane.b32.xlu1 %v237_v15, %s1380_s23 }
  0x48   : > { %373 = vrot.lane.b32.xlu0 %v334_v17, %s1382_s9 }
  0x49   : > { %470 = vrot.lane.b32.xlu1 %v431_v18, %s1381_s26 }
  0x4c   : > { %278 = vrot.lane.b32.xlu0 %v238_v19, %s1380_s23 }
  0x4d   : > { %375 = vrot.lane.b32.xlu1 %v335_v20, %s1382_s9 }
  0x50   : > { %472 = vrot.lane.b32.xlu0 %v432_v23, %s1381_s26 }
  0x51   : > { %280 = vrot.lane.b32.xlu1 %v239_v24, %s1380_s23 }
  0x54   : > { %377 = vrot.lane.b32.xlu0 %v336_v26, %s1382_s9 }
  0x55   : > { %474 = vrot.lane.b32.xlu1 %v433_v27, %s1381_s26 }
  0x58   : > { %282 = vrot.lane.b32.xlu0 %v240_v28, %s1380_s23 }
  0x59   : > { %379 = vrot.lane.b32.xlu1 %v337_v29, %s1382_s9 }
  0x5c   : > { %476 = vrot.lane.b32.xlu0 %v434_v31, %s1381_s26 }
  0x5d   : > { %284 = vrot.lane.b32.xlu1 %v241_v32, %s1380_s23 }
  0x60   : > { %381 = vrot.lane.b32.xlu0 %v338_v34, %s1382_s9 }
  0x61   : > { %478 = vrot.lane.b32.xlu1 %v435_v35, %s1381_s26 }
  0x64   : > { %286 = vrot.lane.b32.xlu0 %v242_v36, %s1380_s23 }
  0x65   : > { %383 = vrot.lane.b32.xlu1 %v339_v37, %s1382_s9 }
  0x68   : > { %480 = vrot.lane.b32.xlu0 %v436_v39, %s1381_s26 }
  0x69   : > { %288 = vrot.lane.b32.xlu1 %v243_v40, %s1380_s23 }
  0x6c   : > { %385 = vrot.lane.b32.xlu0 %v340_v42, %s1382_s9 }
  0x6d   : > { %482 = vrot.lane.b32.xlu1 %v437_v43, %s1381_s26 }
  0x70   : > { %290 = vrot.lane.b32.xlu0 %v244_v44, %s1380_s23 }
  0x71   : > { %387 = vrot.lane.b32.xlu1 %v341_v45, %s1382_s9 }
  0x74   : > { %484 = vrot.lane.b32.xlu0 %v438_v46, %s1381_s26 }
  0x75   : > { %292 = vrot.lane.b32.xlu1 %v245_v47, %s1380_s23 }
  0x78   : > { %389 = vrot.lane.b32.xlu0 %v342_v48, %s1382_s9 }
  0x79   : > { %486 = vrot.lane.b32.xlu1 %v439_v49, %s1381_s26 }
  0x8e   : > { %v263_v50 = vpop.permute.xlu0 %262 }
  0x8f   : > { %v457_v51 = vpop.permute.xlu1 %456  ;;  %311 = vst.msk [vmem:[#allocation2] sm:$0xff] %vm310_vm1, %v263_v50 }
  0x92   : > { %v360_v52 = vpop.permute.xlu0 %359 }
  0x93   : > { %v265_v53 = vpop.permute.xlu1 %264  ;;  %408 = vst.msk [vmem:[#allocation2] sm:$0xff] %vm407_vm2, %v360_v52 }
  0x94   : > { %312 = vst.msk [vmem:[#allocation2 + $0x8] sm:$0xff] %vm310_vm1, %v265_v53 }
  0x95   : > { %505 = vst.msk [vmem:[#allocation2] sm:$0xff] %vm504_vm3, %v457_v51  ;;  %v890_v51 = vld [vmem:[%s1819_s2] sm:$0xff] }
  0x96   : > { %v362_v54 = vpop.permute.xlu0 %361  ;;  %1134 = vmatprep.mubr.f32.mxu1 %v890_v51 }
  0x97   : > { %v459_v55 = vpop.permute.xlu1 %458  ;;  %409 = vst.msk [vmem:[#allocation2 + $0x8] sm:$0xff] %vm407_vm2, %v362_v54 }
  0x98   : > { %506 = vst.msk [vmem:[#allocation2 + $0x8] sm:$0xff] %vm504_vm3, %v459_v55 }
  0x9a   : > { %v267_v56 = vpop.permute.xlu0 %266 }
  0x9b   : > { %v364_v57 = vpop.permute.xlu1 %363  ;;  %313 = vst.msk [vmem:[#allocation2 + $0x10] sm:$0xff] %vm310_vm1, %v267_v56 }
  0x9c   : > { %v521_v58 = vld [vmem:[#allocation2] sm:$0xff]  ;;  %410 = vst.msk [vmem:[#allocation2 + $0x10] sm:$0xff] %vm407_vm2, %v364_v57 }
  0x9d   : > { %634 = vmatmul.mubr.f32.vlgmr.msra.gmra.mrb[0].mxu0 %v521_v58 }
  0x9e   : > { %639 = vmatprep.mubr.f32.mxu0 %v1379_v21  ;;  %v461_v59 = vpop.permute.xlu0 %460 }
  0x9f   : > { %v269_v60 = vpop.permute.xlu1 %268  ;;  %507 = vst.msk [vmem:[#allocation2 + $0x10] sm:$0xff] %vm504_vm3, %v461_v59  ;;  %v522_v61 = vld [vmem:[#allocation2 + $0x8] sm:$0xff] }
  0xa0   : > { %314 = vst.msk [vmem:[#allocation2 + $0x18] sm:$0xff] %vm310_vm1, %v269_v60 }
  0xa1   : > { %640 = vmatmul.mubr.f32.gmra.mrb[2].mxu0 %v522_v61 }
  0xa2   : > { %645 = vmatprep.mubr.f32.mxu0 %v1379_v21  ;;  %v366_v62 = vpop.permute.xlu0 %365 }
  0xa3   : > { %v463_v63 = vpop.permute.xlu1 %462  ;;  %411 = vst.msk [vmem:[#allocation2 + $0x18] sm:$0xff] %vm407_vm2, %v366_v62 }
  0xa4   : > { %508 = vst.msk [vmem:[#allocation2 + $0x18] sm:$0xff] %vm504_vm3, %v463_v63 }
  0xa6   : > { %v271_v0 = vpop.permute.xlu0 %270  ;;  %v523_v2 = vld [vmem:[#allocation2 + $0x10] sm:$0xff] }
  0xa7   : > { %v368_v1 = vpop.permute.xlu1 %367  ;;  %315 = vst.msk [vmem:[#allocation2 + $0x20] sm:$0xff] %vm310_vm1, %v271_v0  ;;  %646 = vmatmul.mubr.f32.gmra.mrb[4].mxu0 %v523_v2 }
  0xa8   : > { %412 = vst.msk [vmem:[#allocation2 + $0x20] sm:$0xff] %vm407_vm2, %v368_v1  ;;  %651 = vmatprep.mubr.f32.mxu0 %v1379_v21 }
  0xaa   : > { %v465_v3 = vpop.permute.xlu0 %464 }
  0xab   : > { %v273_v4 = vpop.permute.xlu1 %272  ;;  %509 = vst.msk [vmem:[#allocation2 + $0x20] sm:$0xff] %vm504_vm3, %v465_v3  ;;  %v524_v5 = vld [vmem:[#allocation2 + $0x18] sm:$0xff] }
  0xac   : > { %316 = vst.msk [vmem:[#allocation2 + $0x28] sm:$0xff] %vm310_vm1, %v273_v4  ;;  %652 = vmatmul.mubr.f32.gmra.mrb[6].mxu0 %v524_v5 }
  0xad   : > { %657 = vmatprep.mubr.f32.mxu0 %v1379_v21 }
  0xae   : > { %v370_v6 = vpop.permute.xlu0 %369 }
  0xaf   : > { %v467_v7 = vpop.permute.xlu1 %466  ;;  %413 = vst.msk [vmem:[#allocation2 + $0x28] sm:$0xff] %vm407_vm2, %v370_v6 }
  0xb0   : > { %510 = vst.msk [vmem:[#allocation2 + $0x28] sm:$0xff] %vm504_vm3, %v467_v7 }
  0xb2   : > { %v275_v8 = vpop.permute.xlu0 %274  ;;  %v525_v10 = vld [vmem:[#allocation2 + $0x20] sm:$0xff] }
  0xb3   : > { %v372_v9 = vpop.permute.xlu1 %371  ;;  %317 = vst.msk [vmem:[#allocation2 + $0x30] sm:$0xff] %vm310_vm1, %v275_v8  ;;  %658 = vmatmul.mubr.f32.gmra.mrb[8].mxu0 %v525_v10 }
  0xb4   : > { %414 = vst.msk [vmem:[#allocation2 + $0x30] sm:$0xff] %vm407_vm2, %v372_v9  ;;  %663 = vmatprep.mubr.f32.mxu0 %v1379_v21 }
  0xb6   : > { %v469_v11 = vpop.permute.xlu0 %468 }
  0xb7   : > { %v277_v12 = vpop.permute.xlu1 %276  ;;  %511 = vst.msk [vmem:[#allocation2 + $0x30] sm:$0xff] %vm504_vm3, %v469_v11  ;;  %v526_v13 = vld [vmem:[#allocation2 + $0x28] sm:$0xff] }
  0xb8   : > { %318 = vst.msk [vmem:[#allocation2 + $0x38] sm:$0xff] %vm310_vm1, %v277_v12  ;;  %664 = vmatmul.mubr.f32.gmra.mrb[10].mxu0 %v526_v13 }
  0xb9   : > { %669 = vmatprep.mubr.f32.mxu0 %v1379_v21 }
  0xba   : > { %v374_v14 = vpop.permute.xlu0 %373 }
  0xbb   : > { %v471_v15 = vpop.permute.xlu1 %470  ;;  %415 = vst.msk [vmem:[#allocation2 + $0x38] sm:$0xff] %vm407_vm2, %v374_v14 }
  0xbc   : > { %512 = vst.msk [vmem:[#allocation2 + $0x38] sm:$0xff] %vm504_vm3, %v471_v15 }
  0xbe   : > { %v279_v16 = vpop.permute.xlu0 %278  ;;  %v527_v18 = vld [vmem:[#allocation2 + $0x30] sm:$0xff] }
  0xbf   : > { %v376_v17 = vpop.permute.xlu1 %375  ;;  %319 = vst.msk [vmem:[#allocation2 + $0x40] sm:$0xff] %vm310_vm1, %v279_v16  ;;  %670 = vmatmul.mubr.f32.gmra.mrb[12].mxu0 %v527_v18 }
  0xc0   : > { %416 = vst.msk [vmem:[#allocation2 + $0x40] sm:$0xff] %vm407_vm2, %v376_v17  ;;  %675 = vmatprep.mubr.f32.mxu0 %v1379_v21 }
  0xc2   : > { %v473_v19 = vpop.permute.xlu0 %472 }
  0xc3   : > { %v281_v20 = vpop.permute.xlu1 %280  ;;  %513 = vst.msk [vmem:[#allocation2 + $0x40] sm:$0xff] %vm504_vm3, %v473_v19  ;;  %v528_v22 = vld [vmem:[#allocation2 + $0x38] sm:$0xff] }
  0xc4   : > { %320 = vst.msk [vmem:[#allocation2 + $0x48] sm:$0xff] %vm310_vm1, %v281_v20  ;;  %676 = vmatmul.mubr.f32.gmra.mrb[14].mxu0 %v528_v22 }
  0xc5   : > { %681 = vmatprep.mubr.f32.mxu0 %v1379_v21 }
  0xc6   : > { %v378_v23 = vpop.permute.xlu0 %377 }
  0xc7   : > { %v475_v24 = vpop.permute.xlu1 %474  ;;  %417 = vst.msk [vmem:[#allocation2 + $0x48] sm:$0xff] %vm407_vm2, %v378_v23 }
  0xc8   : > { %514 = vst.msk [vmem:[#allocation2 + $0x48] sm:$0xff] %vm504_vm3, %v475_v24 }
  0xca   : > { %v283_v25 = vpop.permute.xlu0 %282  ;;  %v529_v27 = vld [vmem:[#allocation2 + $0x40] sm:$0xff] }
  0xcb   : > { %v380_v26 = vpop.permute.xlu1 %379  ;;  %321 = vst.msk [vmem:[#allocation2 + $0x50] sm:$0xff] %vm310_vm1, %v283_v25  ;;  %682 = vmatmul.mubr.f32.gmra.mrb[16].mxu0 %v529_v27 }
  0xcc   : > { %418 = vst.msk [vmem:[#allocation2 + $0x50] sm:$0xff] %vm407_vm2, %v380_v26  ;;  %687 = vmatprep.mubr.f32.mxu0 %v1379_v21 }
  0xce   : > { %v477_v28 = vpop.permute.xlu0 %476 }
  0xcf   : > { %v285_v29 = vpop.permute.xlu1 %284  ;;  %515 = vst.msk [vmem:[#allocation2 + $0x50] sm:$0xff] %vm504_vm3, %v477_v28  ;;  %v530_v30 = vld [vmem:[#allocation2 + $0x48] sm:$0xff] }
  0xd0   : > { %322 = vst.msk [vmem:[#allocation2 + $0x58] sm:$0xff] %vm310_vm1, %v285_v29  ;;  %688 = vmatmul.mubr.f32.gmra.mrb[18].mxu0 %v530_v30 }
  0xd1   : > { %693 = vmatprep.mubr.f32.mxu0 %v1379_v21 }
  0xd2   : > { %v382_v31 = vpop.permute.xlu0 %381 }
  0xd3   : > { %v479_v32 = vpop.permute.xlu1 %478  ;;  %419 = vst.msk [vmem:[#allocation2 + $0x58] sm:$0xff] %vm407_vm2, %v382_v31 }
  0xd4   : > { %516 = vst.msk [vmem:[#allocation2 + $0x58] sm:$0xff] %vm504_vm3, %v479_v32 }
  0xd6   : > { %v287_v33 = vpop.permute.xlu0 %286  ;;  %v531_v35 = vld [vmem:[#allocation2 + $0x50] sm:$0xff] }
  0xd7   : > { %v384_v34 = vpop.permute.xlu1 %383  ;;  %323 = vst.msk [vmem:[#allocation2 + $0x60] sm:$0xff] %vm310_vm1, %v287_v33  ;;  %694 = vmatmul.mubr.f32.gmra.mrb[20].mxu0 %v531_v35 }
  0xd8   : > { %420 = vst.msk [vmem:[#allocation2 + $0x60] sm:$0xff] %vm407_vm2, %v384_v34  ;;  %699 = vmatprep.mubr.f32.mxu0 %v1379_v21 }
  0xda   : > { %v481_v36 = vpop.permute.xlu0 %480 }
  0xdb   : > { %v289_v37 = vpop.permute.xlu1 %288  ;;  %517 = vst.msk [vmem:[#allocation2 + $0x60] sm:$0xff] %vm504_vm3, %v481_v36  ;;  %v532_v38 = vld [vmem:[#allocation2 + $0x58] sm:$0xff] }
  0xdc   : > { %324 = vst.msk [vmem:[#allocation2 + $0x68] sm:$0xff] %vm310_vm1, %v289_v37  ;;  %700 = vmatmul.mubr.f32.gmra.mrb[22].mxu0 %v532_v38 }
  0xdd   : > { %705 = vmatprep.mubr.f32.mxu0 %v1379_v21 }
  0xde   : > { %v386_v39 = vpop.permute.xlu0 %385 }
  0xdf   : > { %v483_v40 = vpop.permute.xlu1 %482  ;;  %421 = vst.msk [vmem:[#allocation2 + $0x68] sm:$0xff] %vm407_vm2, %v386_v39 }
  0xe0   : > { %518 = vst.msk [vmem:[#allocation2 + $0x68] sm:$0xff] %vm504_vm3, %v483_v40 }
  0xe2   : > { %v291_v41 = vpop.permute.xlu0 %290  ;;  %v533_v43 = vld [vmem:[#allocation2 + $0x60] sm:$0xff] }
  0xe3   : > { %v388_v42 = vpop.permute.xlu1 %387  ;;  %325 = vst.msk [vmem:[#allocation2 + $0x70] sm:$0xff] %vm310_vm1, %v291_v41  ;;  %706 = vmatmul.mubr.f32.gmra.mrb[24].mxu0 %v533_v43 }
  0xe4   : > { %422 = vst.msk [vmem:[#allocation2 + $0x70] sm:$0xff] %vm407_vm2, %v388_v42  ;;  %711 = vmatprep.mubr.f32.mxu0 %v1379_v21 }
  0xe6   : > { %v485_v44 = vpop.permute.xlu0 %484 }
  0xe7   : > { %v293_v45 = vpop.permute.xlu1 %292  ;;  %519 = vst.msk [vmem:[#allocation2 + $0x70] sm:$0xff] %vm504_vm3, %v485_v44  ;;  %v534_v46 = vld [vmem:[#allocation2 + $0x68] sm:$0xff] }
  0xe8   : > { %326 = vst.msk [vmem:[#allocation2 + $0x78] sm:$0xff] %vm310_vm1, %v293_v45  ;;  %712 = vmatmul.mubr.f32.gmra.mrb[26].mxu0 %v534_v46 }
  0xe9   : > { %717 = vmatprep.mubr.f32.mxu0 %v1379_v21 }
  0xea   : > { %v390_v47 = vpop.permute.xlu0 %389 }
  0xeb   : > { %v487_v48 = vpop.permute.xlu1 %486  ;;  %423 = vst.msk [vmem:[#allocation2 + $0x78] sm:$0xff] %vm407_vm2, %v390_v47 }
  0xec   : > { %520 = vst.msk [vmem:[#allocation2 + $0x78] sm:$0xff] %vm504_vm3, %v487_v48 }
  0xee   : > { %v535_v49 = vld [vmem:[#allocation2 + $0x70] sm:$0xff] }
  0xef   : > { %718 = vmatmul.mubr.f32.gmra.mrb[28].mxu0 %v535_v49 }
  0xf0   : > { %723 = vmatprep.mubr.f32.mxu0 %v1379_v21 }
  0xf3   : > { %v536_v50 = vld [vmem:[#allocation2 + $0x78] sm:$0xff] }
  0xf4   : > { %724 = vmatmul.mubr.f32.gmra.mrb[30].mxu0 %v536_v50 }
 0x170   : > { %v635_v52 = vpop.f32.mrb[0].mxu0 }
 0x171   : > { %v730_v53 = vmul.f32 %v635_v52, %v635_v52  ;;  %v637_v54 = vpop.f32.mrb[1].mxu0 }
 0x172   : > { %v746_v55 = vmul.f32 %v637_v54, %v637_v54 }
 0x174   : > { %v762_v56 = vadd.f32 %v746_v55, %v730_v53  ;;  %v641_v57 = vpop.f32.mrb[2].mxu0 }
 0x175   : > { %v731_v58 = vmul.f32 %v641_v57, %v641_v57  ;;  %v643_v59 = vpop.f32.mrb[3].mxu0 }
 0x176   : > { %v747_v60 = vmul.f32 %v643_v59, %v643_v59  ;;  %1263 = vrsqrt.f32 %v762_v56  ;;  %vm780_vm4 = vcmp.eq.f32.partialorder %v762_v56, inf  ;;  %v783_v12 = vand.u32 2147483648, %v762_v56 }
 0x177   : > { %vm782_vm6 = vcmp.eq.f32.partialorder %v762_v56, 0.0 }
 0x178   : > { %v763_v61 = vadd.f32 %v747_v60, %v731_v58 }
 0x17a   : > { %1265 = vrsqrt.f32 %v763_v61  ;;  %v647_v21 = vpop.f32.mrb[4].mxu0  ;;  %vm787_vm5 = vcmp.eq.f32.partialorder %v763_v61, inf  ;;  %v790_v13 = vand.u32 2147483648, %v763_v61  ;;  %vm789_vm7 = vcmp.eq.f32.partialorder %v763_v61, 0.0 }
 0x17b   : > { %v732_v62 = vmul.f32 %v647_v21, %v647_v21  ;;  %v649_v63 = vpop.f32.mrb[5].mxu0 }
 0x17c   : > { %v748_v0 = vmul.f32 %v649_v63, %v649_v63 }
 0x17e   : > { %v764_v1 = vadd.f32 %v748_v0, %v732_v62 }
 0x17f   : > { %v653_v3 = vpop.f32.mrb[6].mxu0 }
 0x180   : > { %v1264_v2 = vpop.eup %1263  ;;  %1267 = vrsqrt.f32 %v764_v1  ;;  %v733_v4 = vmul.f32 %v653_v3, %v653_v3  ;;  %v655_v5 = vpop.f32.mrb[7].mxu0  ;;  %vm794_vm8 = vcmp.eq.f32.partialorder %v764_v1, inf  ;;  %v797_v34 = vand.u32 2147483648, %v764_v1 }
 0x181   : > { %v779_v6 = vmul.f32 %v1264_v2, %v762_v56  ;;  %v749_v7 = vmul.f32 %v655_v5, %v655_v5  ;;  %vm796_vm10 = vcmp.eq.f32.partialorder %v764_v1, 0.0 }
 0x183   : > { %v765_v9 = vadd.f32 %v749_v7, %v733_v4  ;;  %v781_v10 = vsel %vm780_vm4, %v762_v56, %v779_v6 }
 0x184   : > { %v1266_v8 = vpop.eup %1265  ;;  %v784_v18 = vsel %vm782_vm6, %v783_v12, %v781_v10 }
 0x185   : > { %v786_v11 = vmul.f32 %v1266_v8, %v763_v61  ;;  %1269 = vrsqrt.f32 %v765_v9  ;;  %vm801_vm9 = vcmp.eq.f32.partialorder %v765_v9, inf  ;;  %v804_v35 = vand.u32 2147483648, %v765_v9 }
 0x186   : > { %v659_v14 = vpop.f32.mrb[8].mxu0  ;;  %vm803_vm11 = vcmp.eq.f32.partialorder %v765_v9, 0.0 }
 0x187   : > { %v788_v15 = vsel %vm787_vm5, %v763_v61, %v786_v11  ;;  %v734_v16 = vmul.f32 %v659_v14, %v659_v14  ;;  %v661_v17 = vpop.f32.mrb[9].mxu0 }
 0x188   : > { %v791_v19 = vsel %vm789_vm7, %v790_v13, %v788_v15  ;;  %v750_v20 = vmul.f32 %v661_v17, %v661_v17 }
 0x189   : > { %v1169_v22 = vpack.c.bf16 %v791_v19, %v784_v18 }
 0x18a   : > { %v1268_v23 = vpop.eup %1267  ;;  %v766_v24 = vadd.f32 %v750_v20, %v734_v16 }
 0x18b   : > { %1170 = vmatprep.subr.bf16.mxu1 %v1169_v22  ;;  %v665_v25 = vpop.f32.mrb[10].mxu0  ;;  %v793_v28 = vmul.f32 %v1268_v23, %v764_v1 }
 0x18c   : > { %1172 = vmatpush3.bf16.xpose.msra.mxu1 %v1169_v22  ;;  %1271 = vrsqrt.f32 %v766_v24  ;;  %v735_v26 = vmul.f32 %v665_v25, %v665_v25  ;;  %v667_v27 = vpop.f32.mrb[11].mxu0  ;;  %vm808_vm12 = vcmp.eq.f32.partialorder %v766_v24, inf  ;;  %v811_v55 = vand.u32 2147483648, %v766_v24 }
 0x18d   : > { %v751_v29 = vmul.f32 %v667_v27, %v667_v27  ;;  %v795_v32 = vsel %vm794_vm8, %v764_v1, %v793_v28  ;;  %vm810_vm14 = vcmp.eq.f32.partialorder %v766_v24, 0.0 }
 0x18e   : > { %v798_v40 = vsel %vm796_vm10, %v797_v34, %v795_v32 }
 0x18f   : > { %v1270_v30 = vpop.eup %1269  ;;  %v767_v31 = vadd.f32 %v751_v29, %v735_v26 }
 0x190   : > { %v800_v33 = vmul.f32 %v1270_v30, %v765_v9 }
 0x191   : > { %1273 = vrsqrt.f32 %v767_v31  ;;  %vm815_vm13 = vcmp.eq.f32.partialorder %v767_v31, inf  ;;  %v818_v56 = vand.u32 2147483648, %v767_v31  ;;  %vm817_vm15 = vcmp.eq.f32.partialorder %v767_v31, 0.0 }
 0x192   : > { %v671_v36 = vpop.f32.mrb[12].mxu0  ;;  %v802_v37 = vsel %vm801_vm9, %v765_v9, %v800_v33 }
 0x193   : > { %v736_v38 = vmul.f32 %v671_v36, %v671_v36  ;;  %v673_v39 = vpop.f32.mrb[13].mxu0  ;;  %v805_v41 = vsel %vm803_vm11, %v804_v35, %v802_v37 }
 0x194   : > { %v752_v42 = vmul.f32 %v673_v39, %v673_v39  ;;  %v1173_v43 = vpack.c.bf16 %v805_v41, %v798_v40 }
 0x196   : > { %v1272_v44 = vpop.eup %1271  ;;  %v768_v45 = vadd.f32 %v752_v42, %v736_v38  ;;  %1174 = vmatprep.subr.bf16.mxu1 %v1173_v43 }
 0x197   : > { %v677_v46 = vpop.f32.mrb[14].mxu0  ;;  %1176 = vmatpush3.bf16.xpose.msra.mxu1 %v1173_v43  ;;  %v807_v49 = vmul.f32 %v1272_v44, %v766_v24 }
 0x198   : > { %1275 = vrsqrt.f32 %v768_v45  ;;  %v737_v47 = vmul.f32 %v677_v46, %v677_v46  ;;  %v679_v48 = vpop.f32.mrb[15].mxu0  ;;  %vm822_vm0 = vcmp.eq.f32.partialorder %v768_v45, inf  ;;  %v825_v11 = vand.u32 2147483648, %v768_v45 }
 0x199   : > { %v753_v50 = vmul.f32 %v679_v48, %v679_v48  ;;  %v809_v53 = vsel %vm808_vm12, %v766_v24, %v807_v49  ;;  %vm824_vm2 = vcmp.eq.f32.partialorder %v768_v45, 0.0 }
 0x19a   : > { %v812_v61 = vsel %vm810_vm14, %v811_v55, %v809_v53 }
 0x19b   : > { %v1274_v51 = vpop.eup %1273  ;;  %v769_v52 = vadd.f32 %v753_v50, %v737_v47 }
 0x19c   : > { %v814_v54 = vmul.f32 %v1274_v51, %v767_v31 }
 0x19d   : > { %1277 = vrsqrt.f32 %v769_v52  ;;  %vm829_vm1 = vcmp.eq.f32.partialorder %v769_v52, inf  ;;  %v832_v12 = vand.u32 2147483648, %v769_v52  ;;  %vm831_vm3 = vcmp.eq.f32.partialorder %v769_v52, 0.0 }
 0x19e   : > { %v683_v57 = vpop.f32.mrb[16].mxu0  ;;  %v816_v58 = vsel %vm815_vm13, %v767_v31, %v814_v54 }
 0x19f   : > { %v738_v59 = vmul.f32 %v683_v57, %v683_v57  ;;  %v685_v60 = vpop.f32.mrb[17].mxu0  ;;  %v819_v21 = vsel %vm817_vm15, %v818_v56, %v816_v58 }
 0x1a0   : > { %v754_v62 = vmul.f32 %v685_v60, %v685_v60  ;;  %v1177_v63 = vpack.c.bf16 %v819_v21, %v812_v61 }
 0x1a2   : > { %v1276_v0 = vpop.eup %1275  ;;  %v770_v1 = vadd.f32 %v754_v62, %v738_v59  ;;  %1178 = vmatprep.subr.bf16.mxu1 %v1177_v63 }
 0x1a3   : > { %v689_v2 = vpop.f32.mrb[18].mxu0  ;;  %1180 = vmatpush3.bf16.xpose.msra.mxu1 %v1177_v63  ;;  %v821_v5 = vmul.f32 %v1276_v0, %v768_v45 }
 0x1a4   : > { %1279 = vrsqrt.f32 %v770_v1  ;;  %v739_v3 = vmul.f32 %v689_v2, %v689_v2  ;;  %v691_v4 = vpop.f32.mrb[19].mxu0  ;;  %vm836_vm4 = vcmp.eq.f32.partialorder %v770_v1, inf  ;;  %v839_v33 = vand.u32 2147483648, %v770_v1 }
 0x1a5   : > { %v755_v6 = vmul.f32 %v691_v4, %v691_v4  ;;  %v823_v9 = vsel %vm822_vm0, %v768_v45, %v821_v5  ;;  %vm838_vm6 = vcmp.eq.f32.partialorder %v770_v1, 0.0 }
 0x1a6   : > { %v826_v17 = vsel %vm824_vm2, %v825_v11, %v823_v9 }
 0x1a7   : > { %v1278_v7 = vpop.eup %1277  ;;  %v771_v8 = vadd.f32 %v755_v6, %v739_v3 }
 0x1a8   : > { %v828_v10 = vmul.f32 %v1278_v7, %v769_v52 }
 0x1a9   : > { %1281 = vrsqrt.f32 %v771_v8  ;;  %vm843_vm5 = vcmp.eq.f32.partialorder %v771_v8, inf  ;;  %v846_v34 = vand.u32 2147483648, %v771_v8  ;;  %vm845_vm7 = vcmp.eq.f32.partialorder %v771_v8, 0.0 }
 0x1aa   : > { %v695_v13 = vpop.f32.mrb[20].mxu0  ;;  %v830_v14 = vsel %vm829_vm1, %v769_v52, %v828_v10 }
 0x1ab   : > { %v740_v15 = vmul.f32 %v695_v13, %v695_v13  ;;  %v697_v16 = vpop.f32.mrb[21].mxu0  ;;  %v833_v18 = vsel %vm831_vm3, %v832_v12, %v830_v14 }
 0x1ac   : > { %v756_v19 = vmul.f32 %v697_v16, %v697_v16  ;;  %v1181_v20 = vpack.c.bf16 %v833_v18, %v826_v17 }
 0x1ae   : > { %v1280_v22 = vpop.eup %1279  ;;  %v772_v23 = vadd.f32 %v756_v19, %v740_v15  ;;  %1182 = vmatprep.subr.bf16.mxu1 %v1181_v20 }
 0x1af   : > { %v701_v24 = vpop.f32.mrb[22].mxu0  ;;  %1184 = vmatpush3.bf16.xpose.msra.mxu1 %v1181_v20  ;;  %v835_v27 = vmul.f32 %v1280_v22, %v770_v1 }
 0x1b0   : > { %1283 = vrsqrt.f32 %v772_v23  ;;  %v741_v25 = vmul.f32 %v701_v24, %v701_v24  ;;  %v703_v26 = vpop.f32.mrb[23].mxu0  ;;  %vm850_vm8 = vcmp.eq.f32.partialorder %v772_v23, inf  ;;  %v853_v54 = vand.u32 2147483648, %v772_v23 }
 0x1b1   : > { %v757_v28 = vmul.f32 %v703_v26, %v703_v26  ;;  %v837_v31 = vsel %vm836_vm4, %v770_v1, %v835_v27  ;;  %vm852_vm10 = vcmp.eq.f32.partialorder %v772_v23, 0.0 }
 0x1b2   : > { %v840_v39 = vsel %vm838_vm6, %v839_v33, %v837_v31 }
 0x1b3   : > { %v1282_v29 = vpop.eup %1281  ;;  %v773_v30 = vadd.f32 %v757_v28, %v741_v25  ;;  %v891_v28 = vld [vmem:[%s1819_s2 + $0x8] sm:$0xff] }
 0x1b4   : > { %v842_v32 = vmul.f32 %v1282_v29, %v771_v8 }
 0x1b5   : > { %1285 = vrsqrt.f32 %v773_v30  ;;  %vm857_vm9 = vcmp.eq.f32.partialorder %v773_v30, inf  ;;  %v860_v55 = vand.u32 2147483648, %v773_v30  ;;  %vm859_vm11 = vcmp.eq.f32.partialorder %v773_v30, 0.0 }
 0x1b6   : > { %v707_v35 = vpop.f32.mrb[24].mxu0  ;;  %v844_v36 = vsel %vm843_vm5, %v771_v8, %v842_v32 }
 0x1b7   : > { %v742_v37 = vmul.f32 %v707_v35, %v707_v35  ;;  %v709_v38 = vpop.f32.mrb[25].mxu0  ;;  %v847_v40 = vsel %vm845_vm7, %v846_v34, %v844_v36 }
 0x1b8   : > { %v758_v41 = vmul.f32 %v709_v38, %v709_v38  ;;  %v1185_v42 = vpack.c.bf16 %v847_v40, %v840_v39 }
 0x1ba   : > { %v1284_v43 = vpop.eup %1283  ;;  %v774_v44 = vadd.f32 %v758_v41, %v742_v37  ;;  %1186 = vmatprep.subr.bf16.mxu1 %v1185_v42 }
 0x1bb   : > { %v713_v45 = vpop.f32.mrb[26].mxu0  ;;  %1188 = vmatpush3.bf16.xpose.msra.mxu1 %v1185_v42  ;;  %v849_v48 = vmul.f32 %v1284_v43, %v772_v23 }
 0x1bc   : > { %1287 = vrsqrt.f32 %v774_v44  ;;  %v743_v46 = vmul.f32 %v713_v45, %v713_v45  ;;  %v715_v47 = vpop.f32.mrb[27].mxu0  ;;  %vm864_vm12 = vcmp.eq.f32.partialorder %v774_v44, inf  ;;  %v867_v10 = vand.u32 2147483648, %v774_v44 }
 0x1bd   : > { %v759_v49 = vmul.f32 %v715_v47, %v715_v47  ;;  %v851_v52 = vsel %vm850_vm8, %v772_v23, %v849_v48  ;;  %vm866_vm14 = vcmp.eq.f32.partialorder %v774_v44, 0.0 }
 0x1be   : > { %v854_v60 = vsel %vm852_vm10, %v853_v54, %v851_v52 }
 0x1bf   : > { %v1286_v50 = vpop.eup %1285  ;;  %v775_v51 = vadd.f32 %v759_v49, %v743_v46 }
 0x1c0   : > { %v856_v53 = vmul.f32 %v1286_v50, %v773_v30 }
 0x1c1   : > { %1289 = vrsqrt.f32 %v775_v51  ;;  %vm871_vm13 = vcmp.eq.f32.partialorder %v775_v51, inf  ;;  %v874_v11 = vand.u32 2147483648, %v775_v51  ;;  %vm873_vm15 = vcmp.eq.f32.partialorder %v775_v51, 0.0 }
 0x1c2   : > { %v719_v56 = vpop.f32.mrb[28].mxu0  ;;  %v858_v57 = vsel %vm857_vm9, %v773_v30, %v856_v53 }
 0x1c3   : > { %v744_v58 = vmul.f32 %v719_v56, %v719_v56  ;;  %v721_v59 = vpop.f32.mrb[29].mxu0  ;;  %v861_v61 = vsel %vm859_vm11, %v860_v55, %v858_v57 }
 0x1c4   : > { %v760_v21 = vmul.f32 %v721_v59, %v721_v59  ;;  %v1189_v62 = vpack.c.bf16 %v861_v61, %v854_v60 }
 0x1c6   : > { %v1288_v63 = vpop.eup %1287  ;;  %v776_v0 = vadd.f32 %v760_v21, %v744_v58  ;;  %1190 = vmatprep.subr.bf16.mxu1 %v1189_v62 }
 0x1c7   : > { %v725_v1 = vpop.f32.mrb[30].mxu0  ;;  %1192 = vmatpush3.bf16.xpose.msra.mxu1 %v1189_v62  ;;  %v863_v4 = vmul.f32 %v1288_v63, %v774_v44 }
 0x1c8   : > { %1291 = vrsqrt.f32 %v776_v0  ;;  %v745_v2 = vmul.f32 %v725_v1, %v725_v1  ;;  %v727_v3 = vpop.f32.mrb[31].mxu0  ;;  %vm878_vm0 = vcmp.eq.f32.partialorder %v776_v0, inf  ;;  %v881_v22 = vand.u32 2147483648, %v776_v0 }
 0x1c9   : > { %v761_v5 = vmul.f32 %v727_v3, %v727_v3  ;;  %v865_v8 = vsel %vm864_vm12, %v774_v44, %v863_v4  ;;  %vm880_vm2 = vcmp.eq.f32.partialorder %v776_v0, 0.0 }
 0x1ca   : > { %v868_v13 = vsel %vm866_vm14, %v867_v10, %v865_v8 }
 0x1cb   : > { %v1290_v6 = vpop.eup %1289  ;;  %v777_v7 = vadd.f32 %v761_v5, %v745_v2 }
 0x1cc   : > { %v870_v9 = vmul.f32 %v1290_v6, %v775_v51 }
 0x1cd   : > { %1293 = vrsqrt.f32 %v777_v7  ;;  %vm885_vm1 = vcmp.eq.f32.partialorder %v777_v7, inf  ;;  %v888_v23 = vand.u32 2147483648, %v777_v7  ;;  %vm887_vm3 = vcmp.eq.f32.partialorder %v777_v7, 0.0 }
 0x1ce   : > { %v872_v12 = vsel %vm871_vm13, %v775_v51, %v870_v9 }
 0x1cf   : > { %v875_v14 = vsel %vm873_vm15, %v874_v11, %v872_v12 }
 0x1d0   : > { %v1193_v15 = vpack.c.bf16 %v875_v14, %v868_v13 }
 0x1d2   : > { %v1292_v16 = vpop.eup %1291  ;;  %1194 = vmatprep.subr.bf16.mxu1 %v1193_v15 }
 0x1d3   : > { %1196 = vmatpush3.bf16.xpose.msra.mxu1 %v1193_v15  ;;  %v877_v17 = vmul.f32 %v1292_v16, %v776_v0 }
 0x1d5   : > { %v879_v19 = vsel %vm878_vm0, %v776_v0, %v877_v17 }
 0x1d6   : > { %v882_v25 = vsel %vm880_vm2, %v881_v22, %v879_v19 }
 0x1d7   : > { %v1294_v18 = vpop.eup %1293 }
 0x1d8   : > { %v884_v20 = vmul.f32 %v1294_v18, %v777_v7 }
 0x1da   : > { %v886_v24 = vsel %vm885_vm1, %v777_v7, %v884_v20 }
 0x1db   : > { %v889_v26 = vsel %vm887_vm3, %v888_v23, %v886_v24 }
 0x1dc   : > { %v1197_v27 = vpack.c.bf16 %v889_v26, %v882_v25 }
 0x1de   : > { %1198 = vmatprep.subr.bf16.mxu1 %v1197_v27 }
 0x1df   : > { %1200 = vmatpush3.bf16.xpose.msra.mxu1 %v1197_v27 }
 0x1e6   : > { %1135 = vmatmul.mubr.f32.vlgmr.msra.gmra.mrb[0].mxu1 %v891_v28 }
 0x2b9   : > { %v1136_v29 = vpop.f32.mrb[0].mxu1 }
 0x2ba   : > { %v968_v30 = vmax.f32 %v1136_v29, 1e-05  ;;  %v958_v31 = vpop.f32.mrb[1].mxu1 }
 0x2bb   : > { %v967_v32 = vmax.f32 %v958_v31, 1e-05 }
 0x2bc   : > { %1295 = vlog2.f32 %v968_v30 }
 0x2bd   : > { %1297 = vlog2.f32 %v967_v32 }
 0x2c6   : > { %v1296_v33 = vpop.eup %1295 }
 0x2c7   : > { %v1298_v34 = vpop.eup %1297  ;;  %v972_v35 = vmul.f32 0.6931472, %v1296_v33 }
 0x2c8   : > { %v970_v36 = vmul.f32 0.6931472, %v1298_v34 }
 0x2c9   : > { %974 = vst [vmem:[%s187_s21 + $0x8] sm:$0xff] %v972_v35 }
 0x2ca   : > { %973 = vst [vmem:[%s187_s21] sm:$0xff] %v970_v36 }
 0x2cb   : > { %1312 = shalt.err (!%p1309_p5)
}
 0x2cc   : > { %s1313_s11 = scalar_lea.hbm %s1769_s4, 256  ;;  %s1317_s26 = scalar_lea.hbm %s1820_s3, 512 }
 0x2cd   : > { %p1314_p6 = scmp.ne.s32.totalorder %s1769_s4, %s1313_s11  ;;  %p1318_p10 = scmp.lt.u32.totalorder %s1769_s4, %s1820_s3 }
 0x2ce   : > { %p1319_p11 = scmp.lt.u32.totalorder %s1317_s26, %s1313_s11  ;;  %p1321_p13 = scmp.lt.u32.totalorder %s1313_s11, %s1769_s4 }
 0x2cf   : > { %p1315_p7 = pnand %p1314_p6, %p1446_p4 }
 0x2d0   : > { %p1320_p12 = por %p1319_p11, %p1318_p10 }
 0x2d1   : > { %p1316_p9 = pneg %p1315_p7 }
 0x2d2   : > { %p1322_p0 = por %p1321_p13, %p1320_p12 }
 0x2d4   : > { %p1323_p1 = pnand %p1322_p0, %p1316_p9 }
 0x2d6   : > { %1326 = shalt.err (!%p1323_p1)
}
 0x2d7   : > { %s1384_s19 = smov 128   ;;  %s1385_s21 = smov 8  }
 0x2d8   : > { %1202 = dma.vmem_to_hbm [thread:$0]  (%p1446_p4), %s1764_s27, 256, %s1769_s4, %s1771_s5, %s1384_s19, %s1384_s19, %s1385_s21  }
 0x2d9 PF: > { %p1208_p2 = scmp.ge.s32.totalorder %s1377_s17, 2  ;;  %s1005_s28 = sand.u32 1, %s1357_s12  }
 0x2da   : > { %s1006_s29 = scalar_lea.sflag [#allocation4], %s1005_s28 }
 0x2db   : > { %p1205_p3 = pnand %p1208_p2, %p1453_p8 }
 0x2dd   : > { %1352 = dma.done.wait (!%p1205_p3), %s1006_s29, 256  }
 0x2de   : > { %1354 = vsyncadd (!%p1205_p3), %s1006_s29, 4294967040  ;;  %s16_s17 = sadd.s32 1, %s1377_s17   ;;  %s1823_s12 = smov %s1361_s13 }
 0x2df   : > { %p13_p5 = scmp.ge.s32.totalorder %s16_s17, 4   ;;  %s1824_s13 = smov %s1365_s14 }
 0x2e0   : > { %s1825_s14 = smov %s1459_s25  ;;  %s1826_s15 = smov %s1373_s16 }
 0x2e1   : > { %s1827_s16 = smov %s1829_s20  ;;  %15 = sbr.rel (!%p13_p5) target bundleno = 4 (0x4), region = 67 }
 0x2e8   :  { %1011 = vsyncpa [#allocation4], 1 }
 0x2e9   :  { %1013 = vsyncpa [#allocation4 + $0x1], 1 }

// kernel: tpu_custom_call.1
= control target key start
LH: loop header
LB: loop body
LE: loop exit
PB: predicated region body
PF: predicated region fallthrough
CT: control target
= control target key end

     0   :  { %8 = vsyncpa [#allocation4], 0  ;;  %s1817_s0 = inlined_call_operand.vmem [shape: f32[2,1,136,32], index: 0, kind: input, shape index: {}]   ;;  %s1818_s1 = inlined_call_operand.vmem [shape: f32[128,256], index: 1, kind: input, shape index: {}]   ;;  %s1819_s2 = inlined_call_operand.vmem [shape: f32[16,128], index: 2, kind: input, shape index: {}]   ;;  %s1820_s3 = inlined_call_operand.hbm [shape: f32[2,16,128], index: 3, kind: output, shape index: {}]  }
   0x1   :  { %10 = vsyncpa [#allocation4 + $0x1], 0  ;;  %s1406_s12 = smov 0   ;;  %s1408_s13 = smov 0  }
   0x2   :  { %s1410_s14 = smov 0   ;;  %s1412_s15 = smov 0  }
   0x3   :  { %s1414_s16 = smov 0   ;;  %s1416_s17 = smov 0  }
   0x4 LB: > { %s1071_s18 = sadd.s32 4294967295, %s1377_s17   ;;  %s1072_s19 = sadd.s32 4294967294, %s1377_s17   ;;  %s1377_s17 = sphi %s1416_s17, %s16_s17   ;;  %s1373_s16 = sphi %s1414_s16, %s1827_s16   ;;  %s1369_s15 = sphi %s1412_s15, %s1826_s15   ;;  %s1365_s14 = sphi %s1410_s14, %s1825_s14   ;;  %s1361_s13 = sphi %s1408_s13, %s1824_s13   ;;  %s1357_s12 = sphi %s1406_s12, %s1823_s12  }
   0x5   : > { %s28_s20 = sadd.s32 1, %s1373_s16  ;;  %s107_s21 = sadd.s32 1, %s1365_s14 }
   0x6   : > { %p30_p0 = scmp.ge.s32.totalorder %s28_s20, 2  ;;  %p117_p1 = scmp.ne.s32.totalorder %s1365_s14, %s1361_s13 }
   0x7   : > { %p118_p2 = scmp.eq.s32.totalorder %s1071_s18, 1  ;;  %p123_p3 = scmp.ne.s32.totalorder %s1361_s13, %s1357_s12 }
   0x8   : > { %s1829_s20 = smov (%p30_p0, %s28_s20), 0  ;;  %p124_p5 = scmp.eq.s32.totalorder %s1072_s19, 1 }
   0x9   : > { %p1446_p4 = por %p118_p2, %p117_p1  ;;  %s102_s23 = ssub.s32 %s1373_s16, %s1829_s20 }
   0xa   : > { %p1075_p6 = scmp.ge.s32.totalorder %s1377_s17, 1  ;;  %p105_p7 = scmp.eq.s32.totalorder %s102_s23, 0 }
   0xb   : > { %p1453_p8 = por %p124_p5, %p123_p3  ;;  %p160_p9 = scmp.lt.s32.totalorder %s1377_s17, 3 }
   0xc   : > { %s1459_s25 = scalar_select %p105_p7, %s1365_s14, %s107_s21  }
   0xd   : > { %p161_p10 = pnand %p1075_p6, %p160_p9 }
   0xe   : > { %p188_p11 = scmp.lt.s32.totalorder (!%p161_p10), %s1369_s15, 1  ;;  %v538_v0 = vld [vmem:[%s1818_s1 + $0x8] sm:$0xff] (!%p161_p10)  ;;  %v540_v1 = vld [vmem:[%s1818_s1 + $0x18] sm:$0xff] (!%p161_p10)  ;;  %v537_v2 = vld [vmem:[%s1818_s1] sm:$0xff] (!%p161_p10)  ;;  %v1379_v21 = vmov (!%p161_p10), 0.0   ;;  %s1380_s23 = smov (!%p161_p10), 32  }
   0xf   : > { %164 = sbr.rel (%p161_p10) target bundleno = 729 (0x2d9), region = 32  ;;  %v1137_v3 = vpack.c.bf16 (!%p161_p10), %v540_v1, %v538_v0  ;;  %v539_v4 = vld [vmem:[%s1818_s1 + $0x10] sm:$0xff] (!%p161_p10)  ;;  %v542_v5 = vld [vmem:[%s1818_s1 + $0x28] sm:$0xff] (!%p161_p10)  ;;  %v544_v6 = vld [vmem:[%s1818_s1 + $0x38] sm:$0xff] (!%p161_p10)  ;;  %633 = vmatprep.mubr.f32.mxu0 (!%p161_p10), %v1379_v21  ;;  %s1381_s26 = smov (!%p161_p10), 96   ;;  %vm213_vm0 = vcmask (!%p161_p10), 261120  }
  0x10   : > { %v1139_v7 = vpack.c.bf16 (!%p161_p10), %v539_v4, %v537_v2  ;;  %v1141_v8 = vpack.c.bf16 (!%p161_p10), %v544_v6, %v542_v5  ;;  %v541_v9 = vld [vmem:[%s1818_s1 + $0x20] sm:$0xff] (!%p161_p10)  ;;  %v543_v10 = vld [vmem:[%s1818_s1 + $0x30] sm:$0xff] (!%p161_p10)  ;;  %v546_v11 = vld [vmem:[%s1818_s1 + $0x48] sm:$0xff] (!%p161_p10)  ;;  %s1382_s9 = smov (!%p161_p10), 64   ;;  %vm310_vm1 = vcmask (!%p161_p10), 523520   ;;  %vm407_vm2 = vcmask (!%p161_p10), 785920  }
  0x11   : > { %1138 = vmatprep.subr.bf16.mxu0 (!%p161_p10), %v1137_v3  ;;  %v548_v12 = vld [vmem:[%s1818_s1 + $0x58] sm:$0xff] (!%p161_p10)  ;;  %v1143_v13 = vpack.c.bf16 (!%p161_p10), %v543_v10, %v541_v9  ;;  %v545_v15 = vld [vmem:[%s1818_s1 + $0x40] sm:$0xff] (!%p161_p10)  ;;  %v547_v16 = vld [vmem:[%s1818_s1 + $0x50] sm:$0xff] (!%p161_p10)  ;;  %vm504_vm3 = vcmask (!%p161_p10), 1048320   ;;  %s185_s18 = sand.u32 (!%p161_p10), 1, %s1361_s13   ;;  %s1083_s28 = sshll.u32 (!%p161_p10), %s1369_s15, 8 }
  0x12   : > { %1140 = vmatpush1.bf16.msra.mxu0 (!%p161_p10), %v1139_v7  ;;  %v1145_v14 = vpack.c.bf16 (!%p161_p10), %v548_v12, %v546_v11  ;;  %v550_v17 = vld [vmem:[%s1818_s1 + $0x68] sm:$0xff] (!%p161_p10)  ;;  %v552_v20 = vld [vmem:[%s1818_s1 + $0x78] sm:$0xff] (!%p161_p10)  ;;  %v1147_v24 = vpack.c.bf16 (!%p161_p10), %v547_v16, %v545_v15  ;;  %v549_v26 = vld [vmem:[%s1818_s1 + $0x60] sm:$0xff] (!%p161_p10)  ;;  %s1076_s19 = sshll.u32 (!%p161_p10), %s185_s18, 4  ;;  %s1769_s4 = scalar_lea.hbm (!%p161_p10), %s1820_s3, %s1083_s28 }
  0x13   : > { %1142 = vmatprep.subr.bf16.mxu0 (!%p161_p10), %v1141_v8  ;;  %v1149_v25 = vpack.c.bf16 (!%p161_p10), %v552_v20, %v550_v17  ;;  %v551_v27 = vld [vmem:[%s1818_s1 + $0x70] sm:$0xff] (!%p161_p10)  ;;  %v554_v28 = vld [vmem:[%s1818_s1 + $0x88] sm:$0xff] (!%p161_p10)  ;;  %v556_v29 = vld [vmem:[%s1818_s1 + $0x98] sm:$0xff] (!%p161_p10)  ;;  %s187_s21 = scalar_lea.vmem (!%p161_p10), [#allocation3], %s1076_s19  ;;  %s1771_s5 = scalar_lea.sflag (!%p161_p10), [#allocation4], %s185_s18 }
  0x14   : > { %v1151_v32 = vpack.c.bf16 (!%p161_p10), %v551_v27, %v549_v26  ;;  %v1153_v33 = vpack.c.bf16 (!%p161_p10), %v556_v29, %v554_v28  ;;  %v553_v34 = vld [vmem:[%s1818_s1 + $0x80] sm:$0xff] (!%p161_p10)  ;;  %v555_v35 = vld [vmem:[%s1818_s1 + $0x90] sm:$0xff] (!%p161_p10)  ;;  %v558_v42 = vld [vmem:[%s1818_s1 + $0xa8] sm:$0xff] (!%p161_p10)  ;;  %s990_s27 = sshll.u32 (!%p161_p10), %s187_s21, 4  ;;  %s1764_s27 = int_to_ptr.vmem [resolvable:$true] %s990_s27 }
  0x15   : > { %v1155_v38 = vpack.c.bf16 (!%p161_p10), %v555_v35, %v553_v34  ;;  %v560_v45 = vld [vmem:[%s1818_s1 + $0xb8] sm:$0xff] (!%p161_p10)  ;;  %v557_v46 = vld [vmem:[%s1818_s1 + $0xa0] sm:$0xff] (!%p161_p10)  ;;  %v559_v47 = vld [vmem:[%s1818_s1 + $0xb0] sm:$0xff] (!%p161_p10)  ;;  %s1299_s7 = scalar_lea.vmem (!%p161_p10), %s1764_s27, 256 }
  0x16   : > { %s189_s11 = scalar_select %p188_p11, %s1369_s15, 1  ;;  %1144 = vmatpush1.bf16.msra.mxu0 %v1143_v13  ;;  %v1157_v48 = vpack.c.bf16 %v560_v45, %v558_v42  ;;  %v1159_v49 = vpack.c.bf16 %v559_v47, %v557_v46  ;;  %v562_v51 = vld [vmem:[%s1818_s1 + $0xc8] sm:$0xff]  ;;  %v564_v52 = vld [vmem:[%s1818_s1 + $0xd8] sm:$0xff]  ;;  %v561_v55 = vld [vmem:[%s1818_s1 + $0xc0] sm:$0xff] }
  0x17   : > { %1146 = vmatprep.subr.bf16.mxu0 %v1145_v14  ;;  %v1161_v54 = vpack.c.bf16 %v564_v52, %v562_v51  ;;  %v563_v56 = vld [vmem:[%s1818_s1 + $0xd0] sm:$0xff]  ;;  %v566_v57 = vld [vmem:[%s1818_s1 + $0xe8] sm:$0xff]  ;;  %v568_v58 = vld [vmem:[%s1818_s1 + $0xf8] sm:$0xff]  ;;  %p1300_p12 = scmp.ne.s32.totalorder %s1764_s27, %s1299_s7  ;;  %s1383_s15 = smov [#allocation3]  }
  0x18   : > { %s1201_s30 = smul.u32 136, %s189_s11  ;;  %v1163_v62 = vpack.c.bf16 %v563_v56, %v561_v55  ;;  %v1165_v2 = vpack.c.bf16 %v568_v58, %v566_v57  ;;  %v565_v3 = vld [vmem:[%s1818_s1 + $0xe0] sm:$0xff]  ;;  %v567_v4 = vld [vmem:[%s1818_s1 + $0xf0] sm:$0xff]  ;;  %s1303_s8 = sshll.u32 %s1383_s15, 4  ;;  %s1304_s8 = int_to_ptr.vmem [resolvable:$false] %s1303_s8 }
  0x19   : > { %v1167_v7 = vpack.c.bf16 %v567_v4, %v565_v3  ;;  %p1301_p13 = pnand %p1300_p12, %p1446_p4  ;;  %s1305_s10 = scalar_lea.vmem %s1304_s8, 512 }
  0x1a   : > { %s1496_s6 = scalar_lea.vmem %s1817_s0, %s1201_s30  ;;  %1148 = vmatpush1.bf16.msra.mxu0 %v1147_v24  ;;  %p1306_p1 = scmp.lt.s32.totalorder %s1764_s27, %s1304_s8 }
  0x1b   : > { %v230_v18 = vld [vmem:[%s1496_s6 + $0x1] sm:$0xff]  ;;  %v231_v23 = vld [vmem:[%s1496_s6 + $0x9] sm:$0xff]  ;;  %1150 = vmatprep.subr.bf16.mxu0 %v1149_v25  ;;  %v232_v36 = vld [vmem:[%s1496_s6 + $0x11] sm:$0xff]  ;;  %p1302_p0 = pneg %p1301_p13  ;;  %p1307_p2 = scmp.lt.s32.totalorder %s1305_s10, %s1299_s7 }
  0x1c   : > { %v424_v19 = vld [vmem:[%s1496_s6 + $0x3] sm:$0xff]  ;;  %262 = vrot.lane.b32.xlu0 %v230_v18, %s1380_s23  ;;  %v425_v31 = vld [vmem:[%s1496_s6 + $0xb] sm:$0xff]  ;;  %v426_v39 = vld [vmem:[%s1496_s6 + $0x13] sm:$0xff] }
  0x1d   : > { %456 = vrot.lane.b32.xlu1 %v424_v19, %s1381_s26  ;;  %v327_v22 = vld [vmem:[%s1496_s6 + $0x2] sm:$0xff]  ;;  %v328_v30 = vld [vmem:[%s1496_s6 + $0xa] sm:$0xff]  ;;  %v329_v37 = vld [vmem:[%s1496_s6 + $0x12] sm:$0xff]  ;;  %p1308_p3 = por %p1307_p2, %p1306_p1 }
  0x1e   : > { %1152 = vmatpush1.bf16.msra.mxu0 %v1151_v32  ;;  %v233_v40 = vld [vmem:[%s1496_s6 + $0x19] sm:$0xff]  ;;  %v198_v50 = vld [vmem:[%s1496_s6 + $0x8] sm:$0xff]  ;;  %v199_v60 = vld [vmem:[%s1496_s6 + $0x10] sm:$0xff] }
  0x1f   : > { %1154 = vmatprep.subr.bf16.mxu0 %v1153_v33  ;;  %v330_v41 = vld [vmem:[%s1496_s6 + $0x1a] sm:$0xff]  ;;  %215 = vst.msk [vmem:[#allocation2 + $0x8] sm:$0xff] %vm213_vm0, %v198_v50  ;;  %v331_v59 = vld [vmem:[%s1496_s6 + $0x22] sm:$0xff]  ;;  %216 = vst.msk [vmem:[#allocation2 + $0x10] sm:$0xff] %vm213_vm0, %v199_v60  ;;  %p1309_p5 = pnand %p1308_p3, %p1302_p0 }
  0x20   : > { %359 = vrot.lane.b32.xlu0 %v327_v22, %s1382_s9  ;;  %v427_v43 = vld [vmem:[%s1496_s6 + $0x1b] sm:$0xff]  ;;  %v202_v0 = vld [vmem:[%s1496_s6 + $0x28] sm:$0xff]  ;;  %v203_v1 = vld [vmem:[%s1496_s6 + $0x30] sm:$0xff] }
  0x21   : > { %264 = vrot.lane.b32.xlu1 %v231_v23, %s1380_s23  ;;  %v197_v44 = vld [vmem:[%s1496_s6] sm:$0xff]  ;;  %v200_v61 = vld [vmem:[%s1496_s6 + $0x18] sm:$0xff]  ;;  %219 = vst.msk [vmem:[#allocation2 + $0x28] sm:$0xff] %vm213_vm0, %v202_v0  ;;  %220 = vst.msk [vmem:[#allocation2 + $0x30] sm:$0xff] %vm213_vm0, %v203_v1 }
  0x22   : > { %1156 = vmatpush1.bf16.msra.mxu0 %v1155_v38  ;;  %214 = vst.msk [vmem:[#allocation2] sm:$0xff] %vm213_vm0, %v197_v44  ;;  %v234_v53 = vld [vmem:[%s1496_s6 + $0x21] sm:$0xff]  ;;  %217 = vst.msk [vmem:[#allocation2 + $0x18] sm:$0xff] %vm213_vm0, %v200_v61  ;;  %v235_v6 = vld [vmem:[%s1496_s6 + $0x29] sm:$0xff] }
  0x23   : > { %1158 = vmatprep.subr.bf16.mxu0 %v1157_v48  ;;  %v201_v63 = vld [vmem:[%s1496_s6 + $0x20] sm:$0xff]  ;;  %v204_v8 = vld [vmem:[%s1496_s6 + $0x38] sm:$0xff]  ;;  %v332_v9 = vld [vmem:[%s1496_s6 + $0x2a] sm:$0xff] }
  0x24   : > { %361 = vrot.lane.b32.xlu0 %v328_v30, %s1382_s9  ;;  %218 = vst.msk [vmem:[#allocation2 + $0x20] sm:$0xff] %vm213_vm0, %v201_v63  ;;  %v428_v5 = vld [vmem:[%s1496_s6 + $0x23] sm:$0xff]  ;;  %221 = vst.msk [vmem:[#allocation2 + $0x38] sm:$0xff] %vm213_vm0, %v204_v8  ;;  %v429_v10 = vld [vmem:[%s1496_s6 + $0x2b] sm:$0xff] }
  0x25   : > { %458 = vrot.lane.b32.xlu1 %v425_v31, %s1381_s26  ;;  %v236_v11 = vld [vmem:[%s1496_s6 + $0x31] sm:$0xff]  ;;  %v205_v13 = vld [vmem:[%s1496_s6 + $0x40] sm:$0xff]  ;;  %v206_v16 = vld [vmem:[%s1496_s6 + $0x48] sm:$0xff] }
  0x26   : > { %1160 = vmatpush1.bf16.msra.mxu0 %v1159_v49  ;;  %v333_v12 = vld [vmem:[%s1496_s6 + $0x32] sm:$0xff]  ;;  %222 = vst.msk [vmem:[#allocation2 + $0x40] sm:$0xff] %vm213_vm0, %v205_v13  ;;  %223 = vst.msk [vmem:[#allocation2 + $0x48] sm:$0xff] %vm213_vm0, %v206_v16  ;;  %v334_v17 = vld [vmem:[%s1496_s6 + $0x3a] sm:$0xff] }
  0x27   : > { %1162 = vmatprep.subr.bf16.mxu0 %v1161_v54  ;;  %v430_v14 = vld [vmem:[%s1496_s6 + $0x33] sm:$0xff]  ;;  %v431_v18 = vld [vmem:[%s1496_s6 + $0x3b] sm:$0xff]  ;;  %v432_v23 = vld [vmem:[%s1496_s6 + $0x43] sm:$0xff] }
  0x28   : > { %266 = vrot.lane.b32.xlu0 %v232_v36, %s1380_s23  ;;  %v237_v15 = vld [vmem:[%s1496_s6 + $0x39] sm:$0xff]  ;;  %v238_v19 = vld [vmem:[%s1496_s6 + $0x41] sm:$0xff]  ;;  %v207_v22 = vld [vmem:[%s1496_s6 + $0x50] sm:$0xff] }
  0x29   : > { %363 = vrot.lane.b32.xlu1 %v329_v37, %s1382_s9  ;;  %v335_v20 = vld [vmem:[%s1496_s6 + $0x42] sm:$0xff]  ;;  %224 = vst.msk [vmem:[#allocation2 + $0x50] sm:$0xff] %vm213_vm0, %v207_v22  ;;  %v208_v25 = vld [vmem:[%s1496_s6 + $0x58] sm:$0xff]  ;;  %v336_v26 = vld [vmem:[%s1496_s6 + $0x4a] sm:$0xff] }
  0x2a   : > { %1164 = vmatpush1.bf16.msra.mxu0 %v1163_v62  ;;  %v239_v24 = vld [vmem:[%s1496_s6 + $0x49] sm:$0xff]  ;;  %225 = vst.msk [vmem:[#allocation2 + $0x58] sm:$0xff] %vm213_vm0, %v208_v25  ;;  %v240_v28 = vld [vmem:[%s1496_s6 + $0x51] sm:$0xff]  ;;  %v209_v30 = vld [vmem:[%s1496_s6 + $0x60] sm:$0xff] }
  0x2b   : > { %1166 = vmatprep.subr.bf16.mxu0 %v1165_v2  ;;  %v433_v27 = vld [vmem:[%s1496_s6 + $0x4b] sm:$0xff]  ;;  %226 = vst.msk [vmem:[#allocation2 + $0x60] sm:$0xff] %vm213_vm0, %v209_v30  ;;  %v434_v31 = vld [vmem:[%s1496_s6 + $0x53] sm:$0xff]  ;;  %v435_v35 = vld [vmem:[%s1496_s6 + $0x5b] sm:$0xff] }
  0x2c   : > { %460 = vrot.lane.b32.xlu0 %v426_v39, %s1381_s26  ;;  %v337_v29 = vld [vmem:[%s1496_s6 + $0x52] sm:$0xff]  ;;  %v210_v33 = vld [vmem:[%s1496_s6 + $0x68] sm:$0xff]  ;;  %v338_v34 = vld [vmem:[%s1496_s6 + $0x5a] sm:$0xff] }
  0x2d   : > { %268 = vrot.lane.b32.xlu1 %v233_v40, %s1380_s23  ;;  %v241_v32 = vld [vmem:[%s1496_s6 + $0x59] sm:$0xff]  ;;  %227 = vst.msk [vmem:[#allocation2 + $0x68] sm:$0xff] %vm213_vm0, %v210_v33  ;;  %v242_v36 = vld [vmem:[%s1496_s6 + $0x61] sm:$0xff]  ;;  %v211_v38 = vld [vmem:[%s1496_s6 + $0x70] sm:$0xff] }
  0x2e   : > { %1168 = vmatpush1.bf16.msra.mxu0 %v1167_v7  ;;  %v339_v37 = vld [vmem:[%s1496_s6 + $0x62] sm:$0xff]  ;;  %228 = vst.msk [vmem:[#allocation2 + $0x70] sm:$0xff] %vm213_vm0, %v211_v38  ;;  %v340_v42 = vld [vmem:[%s1496_s6 + $0x6a] sm:$0xff]  ;;  %v341_v45 = vld [vmem:[%s1496_s6 + $0x72] sm:$0xff] }
  0x2f   : > { %v436_v39 = vld [vmem:[%s1496_s6 + $0x63] sm:$0xff]  ;;  %v244_v44 = vld [vmem:[%s1496_s6 + $0x71] sm:$0xff]  ;;  %v245_v47 = vld [vmem:[%s1496_s6 + $0x79] sm:$0xff] }
  0x30   : > { %365 = vrot.lane.b32.xlu0 %v330_v41, %s1382_s9  ;;  %v243_v40 = vld [vmem:[%s1496_s6 + $0x69] sm:$0xff]  ;;  %v212_v41 = vld [vmem:[%s1496_s6 + $0x78] sm:$0xff] }
  0x31   : > { %462 = vrot.lane.b32.xlu1 %v427_v43, %s1381_s26  ;;  %229 = vst.msk [vmem:[#allocation2 + $0x78] sm:$0xff] %vm213_vm0, %v212_v41  ;;  %v437_v43 = vld [vmem:[%s1496_s6 + $0x6b] sm:$0xff]  ;;  %v438_v46 = vld [vmem:[%s1496_s6 + $0x73] sm:$0xff]  ;;  %v439_v49 = vld [vmem:[%s1496_s6 + $0x7b] sm:$0xff] }
  0x32   : > { %v342_v48 = vld [vmem:[%s1496_s6 + $0x7a] sm:$0xff] }
  0x34   : > { %270 = vrot.lane.b32.xlu0 %v234_v53, %s1380_s23 }
  0x35   : > { %367 = vrot.lane.b32.xlu1 %v331_v59, %s1382_s9 }
  0x38   : > { %464 = vrot.lane.b32.xlu0 %v428_v5, %s1381_s26 }
  0x39   : > { %272 = vrot.lane.b32.xlu1 %v235_v6, %s1380_s23 }
  0x3c   : > { %369 = vrot.lane.b32.xlu0 %v332_v9, %s1382_s9 }
  0x3d   : > { %466 = vrot.lane.b32.xlu1 %v429_v10, %s1381_s26 }
  0x40   : > { %274 = vrot.lane.b32.xlu0 %v236_v11, %s1380_s23 }
  0x41   : > { %371 = vrot.lane.b32.xlu1 %v333_v12, %s1382_s9 }
  0x44   : > { %468 = vrot.lane.b32.xlu0 %v430_v14, %s1381_s26 }
  0x45   : > { %276 = vrot.lane.b32.xlu1 %v237_v15, %s1380_s23 }
  0x48   : > { %373 = vrot.lane.b32.xlu0 %v334_v17, %s1382_s9 }
  0x49   : > { %470 = vrot.lane.b32.xlu1 %v431_v18, %s1381_s26 }
  0x4c   : > { %278 = vrot.lane.b32.xlu0 %v238_v19, %s1380_s23 }
  0x4d   : > { %375 = vrot.lane.b32.xlu1 %v335_v20, %s1382_s9 }
  0x50   : > { %472 = vrot.lane.b32.xlu0 %v432_v23, %s1381_s26 }
  0x51   : > { %280 = vrot.lane.b32.xlu1 %v239_v24, %s1380_s23 }
  0x54   : > { %377 = vrot.lane.b32.xlu0 %v336_v26, %s1382_s9 }
  0x55   : > { %474 = vrot.lane.b32.xlu1 %v433_v27, %s1381_s26 }
  0x58   : > { %282 = vrot.lane.b32.xlu0 %v240_v28, %s1380_s23 }
  0x59   : > { %379 = vrot.lane.b32.xlu1 %v337_v29, %s1382_s9 }
  0x5c   : > { %476 = vrot.lane.b32.xlu0 %v434_v31, %s1381_s26 }
  0x5d   : > { %284 = vrot.lane.b32.xlu1 %v241_v32, %s1380_s23 }
  0x60   : > { %381 = vrot.lane.b32.xlu0 %v338_v34, %s1382_s9 }
  0x61   : > { %478 = vrot.lane.b32.xlu1 %v435_v35, %s1381_s26 }
  0x64   : > { %286 = vrot.lane.b32.xlu0 %v242_v36, %s1380_s23 }
  0x65   : > { %383 = vrot.lane.b32.xlu1 %v339_v37, %s1382_s9 }
  0x68   : > { %480 = vrot.lane.b32.xlu0 %v436_v39, %s1381_s26 }
  0x69   : > { %288 = vrot.lane.b32.xlu1 %v243_v40, %s1380_s23 }
  0x6c   : > { %385 = vrot.lane.b32.xlu0 %v340_v42, %s1382_s9 }
  0x6d   : > { %482 = vrot.lane.b32.xlu1 %v437_v43, %s1381_s26 }
  0x70   : > { %290 = vrot.lane.b32.xlu0 %v244_v44, %s1380_s23 }
  0x71   : > { %387 = vrot.lane.b32.xlu1 %v341_v45, %s1382_s9 }
  0x74   : > { %484 = vrot.lane.b32.xlu0 %v438_v46, %s1381_s26 }
  0x75   : > { %292 = vrot.lane.b32.xlu1 %v245_v47, %s1380_s23 }
  0x78   : > { %389 = vrot.lane.b32.xlu0 %v342_v48, %s1382_s9 }
  0x79   : > { %486 = vrot.lane.b32.xlu1 %v439_v49, %s1381_s26 }
  0x8e   : > { %v263_v50 = vpop.permute.xlu0 %262 }
  0x8f   : > { %v457_v51 = vpop.permute.xlu1 %456  ;;  %311 = vst.msk [vmem:[#allocation2] sm:$0xff] %vm310_vm1, %v263_v50 }
  0x92   : > { %v360_v52 = vpop.permute.xlu0 %359 }
  0x93   : > { %v265_v53 = vpop.permute.xlu1 %264  ;;  %408 = vst.msk [vmem:[#allocation2] sm:$0xff] %vm407_vm2, %v360_v52 }
  0x94   : > { %312 = vst.msk [vmem:[#allocation2 + $0x8] sm:$0xff] %vm310_vm1, %v265_v53 }
  0x95   : > { %505 = vst.msk [vmem:[#allocation2] sm:$0xff] %vm504_vm3, %v457_v51  ;;  %v890_v51 = vld [vmem:[%s1819_s2] sm:$0xff] }
  0x96   : > { %v362_v54 = vpop.permute.xlu0 %361  ;;  %1134 = vmatprep.mubr.f32.mxu1 %v890_v51 }
  0x97   : > { %v459_v55 = vpop.permute.xlu1 %458  ;;  %409 = vst.msk [vmem:[#allocation2 + $0x8] sm:$0xff] %vm407_vm2, %v362_v54 }
  0x98   : > { %506 = vst.msk [vmem:[#allocation2 + $0x8] sm:$0xff] %vm504_vm3, %v459_v55 }
  0x9a   : > { %v267_v56 = vpop.permute.xlu0 %266 }
  0x9b   : > { %v364_v57 = vpop.permute.xlu1 %363  ;;  %313 = vst.msk [vmem:[#allocation2 + $0x10] sm:$0xff] %vm310_vm1, %v267_v56 }
  0x9c   : > { %v521_v58 = vld [vmem:[#allocation2] sm:$0xff]  ;;  %410 = vst.msk [vmem:[#allocation2 + $0x10] sm:$0xff] %vm407_vm2, %v364_v57 }
  0x9d   : > { %634 = vmatmul.mubr.f32.vlgmr.msra.gmra.mrb[0].mxu0 %v521_v58 }
  0x9e   : > { %639 = vmatprep.mubr.f32.mxu0 %v1379_v21  ;;  %v461_v59 = vpop.permute.xlu0 %460 }
  0x9f   : > { %v269_v60 = vpop.permute.xlu1 %268  ;;  %507 = vst.msk [vmem:[#allocation2 + $0x10] sm:$0xff] %vm504_vm3, %v461_v59  ;;  %v522_v61 = vld [vmem:[#allocation2 + $0x8] sm:$0xff] }
  0xa0   : > { %314 = vst.msk [vmem:[#allocation2 + $0x18] sm:$0xff] %vm310_vm1, %v269_v60 }
  0xa1   : > { %640 = vmatmul.mubr.f32.gmra.mrb[2].mxu0 %v522_v61 }
  0xa2   : > { %645 = vmatprep.mubr.f32.mxu0 %v1379_v21  ;;  %v366_v62 = vpop.permute.xlu0 %365 }
  0xa3   : > { %v463_v63 = vpop.permute.xlu1 %462  ;;  %411 = vst.msk [vmem:[#allocation2 + $0x18] sm:$0xff] %vm407_vm2, %v366_v62 }
  0xa4   : > { %508 = vst.msk [vmem:[#allocation2 + $0x18] sm:$0xff] %vm504_vm3, %v463_v63 }
  0xa6   : > { %v271_v0 = vpop.permute.xlu0 %270  ;;  %v523_v2 = vld [vmem:[#allocation2 + $0x10] sm:$0xff] }
  0xa7   : > { %v368_v1 = vpop.permute.xlu1 %367  ;;  %315 = vst.msk [vmem:[#allocation2 + $0x20] sm:$0xff] %vm310_vm1, %v271_v0  ;;  %646 = vmatmul.mubr.f32.gmra.mrb[4].mxu0 %v523_v2 }
  0xa8   : > { %412 = vst.msk [vmem:[#allocation2 + $0x20] sm:$0xff] %vm407_vm2, %v368_v1  ;;  %651 = vmatprep.mubr.f32.mxu0 %v1379_v21 }
  0xaa   : > { %v465_v3 = vpop.permute.xlu0 %464 }
  0xab   : > { %v273_v4 = vpop.permute.xlu1 %272  ;;  %509 = vst.msk [vmem:[#allocation2 + $0x20] sm:$0xff] %vm504_vm3, %v465_v3  ;;  %v524_v5 = vld [vmem:[#allocation2 + $0x18] sm:$0xff] }
  0xac   : > { %316 = vst.msk [vmem:[#allocation2 + $0x28] sm:$0xff] %vm310_vm1, %v273_v4  ;;  %652 = vmatmul.mubr.f32.gmra.mrb[6].mxu0 %v524_v5 }
  0xad   : > { %657 = vmatprep.mubr.f32.mxu0 %v1379_v21 }
  0xae   : > { %v370_v6 = vpop.permute.xlu0 %369 }
  0xaf   : > { %v467_v7 = vpop.permute.xlu1 %466  ;;  %413 = vst.msk [vmem:[#allocation2 + $0x28] sm:$0xff] %vm407_vm2, %v370_v6 }
  0xb0   : > { %510 = vst.msk [vmem:[#allocation2 + $0x28] sm:$0xff] %vm504_vm3, %v467_v7 }
  0xb2   : > { %v275_v8 = vpop.permute.xlu0 %274  ;;  %v525_v10 = vld [vmem:[#allocation2 + $0x20] sm:$0xff] }
  0xb3   : > { %v372_v9 = vpop.permute.xlu1 %371  ;;  %317 = vst.msk [vmem:[#allocation2 + $0x30] sm:$0xff] %vm310_vm1, %v275_v8  ;;  %658 = vmatmul.mubr.f32.gmra.mrb[8].mxu0 %v525_v10 }
  0xb4   : > { %414 = vst.msk [vmem:[#allocation2 + $0x30] sm:$0xff] %vm407_vm2, %v372_v9  ;;  %663 = vmatprep.mubr.f32.mxu0 %v1379_v21 }
  0xb6   : > { %v469_v11 = vpop.permute.xlu0 %468 }
  0xb7   : > { %v277_v12 = vpop.permute.xlu1 %276  ;;  %511 = vst.msk [vmem:[#allocation2 + $0x30] sm:$0xff] %vm504_vm3, %v469_v11  ;;  %v526_v13 = vld [vmem:[#allocation2 + $0x28] sm:$0xff] }
  0xb8   : > { %318 = vst.msk [vmem:[#allocation2 + $0x38] sm:$0xff] %vm310_vm1, %v277_v12  ;;  %664 = vmatmul.mubr.f32.gmra.mrb[10].mxu0 %v526_v13 }
  0xb9   : > { %669 = vmatprep.mubr.f32.mxu0 %v1379_v21 }
  0xba   : > { %v374_v14 = vpop.permute.xlu0 %373 }
  0xbb   : > { %v471_v15 = vpop.permute.xlu1 %470  ;;  %415 = vst.msk [vmem:[#allocation2 + $0x38] sm:$0xff] %vm407_vm2, %v374_v14 }
  0xbc   : > { %512 = vst.msk [vmem:[#allocation2 + $0x38] sm:$0xff] %vm504_vm3, %v471_v15 }
  0xbe   : > { %v279_v16 = vpop.permute.xlu0 %278  ;;  %v527_v18 = vld [vmem:[#allocation2 + $0x30] sm:$0xff] }
  0xbf   : > { %v376_v17 = vpop.permute.xlu1 %375  ;;  %319 = vst.msk [vmem:[#allocation2 + $0x40] sm:$0xff] %vm310_vm1, %v279_v16  ;;  %670 = vmatmul.mubr.f32.gmra.mrb[12].mxu0 %v527_v18 }
  0xc0   : > { %416 = vst.msk [vmem:[#allocation2 + $0x40] sm:$0xff] %vm407_vm2, %v376_v17  ;;  %675 = vmatprep.mubr.f32.mxu0 %v1379_v21 }
  0xc2   : > { %v473_v19 = vpop.permute.xlu0 %472 }
  0xc3   : > { %v281_v20 = vpop.permute.xlu1 %280  ;;  %513 = vst.msk [vmem:[#allocation2 + $0x40] sm:$0xff] %vm504_vm3, %v473_v19  ;;  %v528_v22 = vld [vmem:[#allocation2 + $0x38] sm:$0xff] }
  0xc4   : > { %320 = vst.msk [vmem:[#allocation2 + $0x48] sm:$0xff] %vm310_vm1, %v281_v20  ;;  %676 = vmatmul.mubr.f32.gmra.mrb[14].mxu0 %v528_v22 }
  0xc5   : > { %681 = vmatprep.mubr.f32.mxu0 %v1379_v21 }
  0xc6   : > { %v378_v23 = vpop.permute.xlu0 %377 }
  0xc7   : > { %v475_v24 = vpop.permute.xlu1 %474  ;;  %417 = vst.msk [vmem:[#allocation2 + $0x48] sm:$0xff] %vm407_vm2, %v378_v23 }
  0xc8   : > { %514 = vst.msk [vmem:[#allocation2 + $0x48] sm:$0xff] %vm504_vm3, %v475_v24 }
  0xca   : > { %v283_v25 = vpop.permute.xlu0 %282  ;;  %v529_v27 = vld [vmem:[#allocation2 + $0x40] sm:$0xff] }
  0xcb   : > { %v380_v26 = vpop.permute.xlu1 %379  ;;  %321 = vst.msk [vmem:[#allocation2 + $0x50] sm:$0xff] %vm310_vm1, %v283_v25  ;;  %682 = vmatmul.mubr.f32.gmra.mrb[16].mxu0 %v529_v27 }
  0xcc   : > { %418 = vst.msk [vmem:[#allocation2 + $0x50] sm:$0xff] %vm407_vm2, %v380_v26  ;;  %687 = vmatprep.mubr.f32.mxu0 %v1379_v21 }
  0xce   : > { %v477_v28 = vpop.permute.xlu0 %476 }
  0xcf   : > { %v285_v29 = vpop.permute.xlu1 %284  ;;  %515 = vst.msk [vmem:[#allocation2 + $0x50] sm:$0xff] %vm504_vm3, %v477_v28  ;;  %v530_v30 = vld [vmem:[#allocation2 + $0x48] sm:$0xff] }
  0xd0   : > { %322 = vst.msk [vmem:[#allocation2 + $0x58] sm:$0xff] %vm310_vm1, %v285_v29  ;;  %688 = vmatmul.mubr.f32.gmra.mrb[18].mxu0 %v530_v30 }
  0xd1   : > { %693 = vmatprep.mubr.f32.mxu0 %v1379_v21 }
  0xd2   : > { %v382_v31 = vpop.permute.xlu0 %381 }
  0xd3   : > { %v479_v32 = vpop.permute.xlu1 %478  ;;  %419 = vst.msk [vmem:[#allocation2 + $0x58] sm:$0xff] %vm407_vm2, %v382_v31 }
  0xd4   : > { %516 = vst.msk [vmem:[#allocation2 + $0x58] sm:$0xff] %vm504_vm3, %v479_v32 }
  0xd6   : > { %v287_v33 = vpop.permute.xlu0 %286  ;;  %v531_v35 = vld [vmem:[#allocation2 + $0x50] sm:$0xff] }
  0xd7   : > { %v384_v34 = vpop.permute.xlu1 %383  ;;  %323 = vst.msk [vmem:[#allocation2 + $0x60] sm:$0xff] %vm310_vm1, %v287_v33  ;;  %694 = vmatmul.mubr.f32.gmra.mrb[20].mxu0 %v531_v35 }
  0xd8   : > { %420 = vst.msk [vmem:[#allocation2 + $0x60] sm:$0xff] %vm407_vm2, %v384_v34  ;;  %699 = vmatprep.mubr.f32.mxu0 %v1379_v21 }
  0xda   : > { %v481_v36 = vpop.permute.xlu0 %480 }
  0xdb   : > { %v289_v37 = vpop.permute.xlu1 %288  ;;  %517 = vst.msk [vmem:[#allocation2 + $0x60] sm:$0xff] %vm504_vm3, %v481_v36  ;;  %v532_v38 = vld [vmem:[#allocation2 + $0x58] sm:$0xff] }
  0xdc   : > { %324 = vst.msk [vmem:[#allocation2 + $0x68] sm:$0xff] %vm310_vm1, %v289_v37  ;;  %700 = vmatmul.mubr.f32.gmra.mrb[22].mxu0 %v532_v38 }
  0xdd   : > { %705 = vmatprep.mubr.f32.mxu0 %v1379_v21 }
  0xde   : > { %v386_v39 = vpop.permute.xlu0 %385 }
  0xdf   : > { %v483_v40 = vpop.permute.xlu1 %482  ;;  %421 = vst.msk [vmem:[#allocation2 + $0x68] sm:$0xff] %vm407_vm2, %v386_v39 }
  0xe0   : > { %518 = vst.msk [vmem:[#allocation2 + $0x68] sm:$0xff] %vm504_vm3, %v483_v40 }
  0xe2   : > { %v291_v41 = vpop.permute.xlu0 %290  ;;  %v533_v43 = vld [vmem:[#allocation2 + $0x60] sm:$0xff] }
  0xe3   : > { %v388_v42 = vpop.permute.xlu1 %387  ;;  %325 = vst.msk [vmem:[#allocation2 + $0x70] sm:$0xff] %vm310_vm1, %v291_v41  ;;  %706 = vmatmul.mubr.f32.gmra.mrb[24].mxu0 %v533_v43 }
  0xe4   : > { %422 = vst.msk [vmem:[#allocation2 + $0x70] sm:$0xff] %vm407_vm2, %v388_v42  ;;  %711 = vmatprep.mubr.f32.mxu0 %v1379_v21 }
  0xe6   : > { %v485_v44 = vpop.permute.xlu0 %484 }
  0xe7   : > { %v293_v45 = vpop.permute.xlu1 %292  ;;  %519 = vst.msk [vmem:[#allocation2 + $0x70] sm:$0xff] %vm504_vm3, %v485_v44  ;;  %v534_v46 = vld [vmem:[#allocation2 + $0x68] sm:$0xff] }
  0xe8   : > { %326 = vst.msk [vmem:[#allocation2 + $0x78] sm:$0xff] %vm310_vm1, %v293_v45  ;;  %712 = vmatmul.mubr.f32.gmra.mrb[26].mxu0 %v534_v46 }
  0xe9   : > { %717 = vmatprep.mubr.f32.mxu0 %v1379_v21 }
  0xea   : > { %v390_v47 = vpop.permute.xlu0 %389 }
  0xeb   : > { %v487_v48 = vpop.permute.xlu1 %486  ;;  %423 = vst.msk [vmem:[#allocation2 + $0x78] sm:$0xff] %vm407_vm2, %v390_v47 }
  0xec   : > { %520 = vst.msk [vmem:[#allocation2 + $0x78] sm:$0xff] %vm504_vm3, %v487_v48 }
  0xee   : > { %v535_v49 = vld [vmem:[#allocation2 + $0x70] sm:$0xff] }
  0xef   : > { %718 = vmatmul.mubr.f32.gmra.mrb[28].mxu0 %v535_v49 }
  0xf0   : > { %723 = vmatprep.mubr.f32.mxu0 %v1379_v21 }
  0xf3   : > { %v536_v50 = vld [vmem:[#allocation2 + $0x78] sm:$0xff] }
  0xf4   : > { %724 = vmatmul.mubr.f32.gmra.mrb[30].mxu0 %v536_v50 }
 0x170   : > { %v635_v52 = vpop.f32.mrb[0].mxu0 }
 0x171   : > { %v730_v53 = vmul.f32 %v635_v52, %v635_v52  ;;  %v637_v54 = vpop.f32.mrb[1].mxu0 }
 0x172   : > { %v746_v55 = vmul.f32 %v637_v54, %v637_v54 }
 0x174   : > { %v762_v56 = vadd.f32 %v746_v55, %v730_v53  ;;  %v641_v57 = vpop.f32.mrb[2].mxu0 }
 0x175   : > { %v731_v58 = vmul.f32 %v641_v57, %v641_v57  ;;  %v643_v59 = vpop.f32.mrb[3].mxu0 }
 0x176   : > { %v747_v60 = vmul.f32 %v643_v59, %v643_v59  ;;  %1263 = vrsqrt.f32 %v762_v56  ;;  %vm780_vm4 = vcmp.eq.f32.partialorder %v762_v56, inf  ;;  %v783_v12 = vand.u32 2147483648, %v762_v56 }
 0x177   : > { %vm782_vm6 = vcmp.eq.f32.partialorder %v762_v56, 0.0 }
 0x178   : > { %v763_v61 = vadd.f32 %v747_v60, %v731_v58 }
 0x17a   : > { %1265 = vrsqrt.f32 %v763_v61  ;;  %v647_v21 = vpop.f32.mrb[4].mxu0  ;;  %vm787_vm5 = vcmp.eq.f32.partialorder %v763_v61, inf  ;;  %v790_v13 = vand.u32 2147483648, %v763_v61  ;;  %vm789_vm7 = vcmp.eq.f32.partialorder %v763_v61, 0.0 }
 0x17b   : > { %v732_v62 = vmul.f32 %v647_v21, %v647_v21  ;;  %v649_v63 = vpop.f32.mrb[5].mxu0 }
 0x17c   : > { %v748_v0 = vmul.f32 %v649_v63, %v649_v63 }
 0x17e   : > { %v764_v1 = vadd.f32 %v748_v0, %v732_v62 }
 0x17f   : > { %v653_v3 = vpop.f32.mrb[6].mxu0 }
 0x180   : > { %v1264_v2 = vpop.eup %1263  ;;  %1267 = vrsqrt.f32 %v764_v1  ;;  %v733_v4 = vmul.f32 %v653_v3, %v653_v3  ;;  %v655_v5 = vpop.f32.mrb[7].mxu0  ;;  %vm794_vm8 = vcmp.eq.f32.partialorder %v764_v1, inf  ;;  %v797_v34 = vand.u32 2147483648, %v764_v1 }
 0x181   : > { %v779_v6 = vmul.f32 %v1264_v2, %v762_v56  ;;  %v749_v7 = vmul.f32 %v655_v5, %v655_v5  ;;  %vm796_vm10 = vcmp.eq.f32.partialorder %v764_v1, 0.0 }
 0x183   : > { %v765_v9 = vadd.f32 %v749_v7, %v733_v4  ;;  %v781_v10 = vsel %vm780_vm4, %v762_v56, %v779_v6 }
 0x184   : > { %v1266_v8 = vpop.eup %1265  ;;  %v784_v18 = vsel %vm782_vm6, %v783_v12, %v781_v10 }
 0x185   : > { %v786_v11 = vmul.f32 %v1266_v8, %v763_v61  ;;  %1269 = vrsqrt.f32 %v765_v9  ;;  %vm801_vm9 = vcmp.eq.f32.partialorder %v765_v9, inf  ;;  %v804_v35 = vand.u32 2147483648, %v765_v9 }
 0x186   : > { %v659_v14 = vpop.f32.mrb[8].mxu0  ;;  %vm803_vm11 = vcmp.eq.f32.partialorder %v765_v9, 0.0 }
 0x187   : > { %v788_v15 = vsel %vm787_vm5, %v763_v61, %v786_v11  ;;  %v734_v16 = vmul.f32 %v659_v14, %v659_v14  ;;  %v661_v17 = vpop.f32.mrb[9].mxu0 }
 0x188   : > { %v791_v19 = vsel %vm789_vm7, %v790_v13, %v788_v15  ;;  %v750_v20 = vmul.f32 %v661_v17, %v661_v17 }
 0x189   : > { %v1169_v22 = vpack.c.bf16 %v791_v19, %v784_v18 }
 0x18a   : > { %v1268_v23 = vpop.eup %1267  ;;  %v766_v24 = vadd.f32 %v750_v20, %v734_v16 }
 0x18b   : > { %1170 = vmatprep.subr.bf16.mxu1 %v1169_v22  ;;  %v665_v25 = vpop.f32.mrb[10].mxu0  ;;  %v793_v28 = vmul.f32 %v1268_v23, %v764_v1 }
 0x18c   : > { %1172 = vmatpush3.bf16.xpose.msra.mxu1 %v1169_v22  ;;  %1271 = vrsqrt.f32 %v766_v24  ;;  %v735_v26 = vmul.f32 %v665_v25, %v665_v25  ;;  %v667_v27 = vpop.f32.mrb[11].mxu0  ;;  %vm808_vm12 = vcmp.eq.f32.partialorder %v766_v24, inf  ;;  %v811_v55 = vand.u32 2147483648, %v766_v24 }
 0x18d   : > { %v751_v29 = vmul.f32 %v667_v27, %v667_v27  ;;  %v795_v32 = vsel %vm794_vm8, %v764_v1, %v793_v28  ;;  %vm810_vm14 = vcmp.eq.f32.partialorder %v766_v24, 0.0 }
 0x18e   : > { %v798_v40 = vsel %vm796_vm10, %v797_v34, %v795_v32 }
 0x18f   : > { %v1270_v30 = vpop.eup %1269  ;;  %v767_v31 = vadd.f32 %v751_v29, %v735_v26 }
 0x190   : > { %v800_v33 = vmul.f32 %v1270_v30, %v765_v9 }
 0x191   : > { %1273 = vrsqrt.f32 %v767_v31  ;;  %vm815_vm13 = vcmp.eq.f32.partialorder %v767_v31, inf  ;;  %v818_v56 = vand.u32 2147483648, %v767_v31  ;;  %vm817_vm15 = vcmp.eq.f32.partialorder %v767_v31, 0.0 }
 0x192   : > { %v671_v36 = vpop.f32.mrb[12].mxu0  ;;  %v802_v37 = vsel %vm801_vm9, %v765_v9, %v800_v33 }
 0x193   : > { %v736_v38 = vmul.f32 %v671_v36, %v671_v36  ;;  %v673_v39 = vpop.f32.mrb[13].mxu0  ;;  %v805_v41 = vsel %vm803_vm11, %v804_v35, %v802_v37 }
 0x194   : > { %v752_v42 = vmul.f32 %v673_v39, %v673_v39  ;;  %v1173_v43 = vpack.c.bf16 %v805_v41, %v798_v40 }
 0x196   : > { %v1272_v44 = vpop.eup %1271  ;;  %v768_v45 = vadd.f32 %v752_v42, %v736_v38  ;;  %1174 = vmatprep.subr.bf16.mxu1 %v1173_v43 }
 0x197   : > { %v677_v46 = vpop.f32.mrb[14].mxu0  ;;  %1176 = vmatpush3.bf16.xpose.msra.mxu1 %v1173_v43  ;;  %v807_v49 = vmul.f32 %v1272_v44, %v766_v24 }
 0x198   : > { %1275 = vrsqrt.f32 %v768_v45  ;;  %v737_v47 = vmul.f32 %v677_v46, %v677_v46  ;;  %v679_v48 = vpop.f32.mrb[15].mxu0  ;;  %vm822_vm0 = vcmp.eq.f32.partialorder %v768_v45, inf  ;;  %v825_v11 = vand.u32 2147483648, %v768_v45 }
 0x199   : > { %v753_v50 = vmul.f32 %v679_v48, %v679_v48  ;;  %v809_v53 = vsel %vm808_vm12, %v766_v24, %v807_v49  ;;  %vm824_vm2 = vcmp.eq.f32.partialorder %v768_v45, 0.0 }
 0x19a   : > { %v812_v61 = vsel %vm810_vm14, %v811_v55, %v809_v53 }
 0x19b   : > { %v1274_v51 = vpop.eup %1273  ;;  %v769_v52 = vadd.f32 %v753_v50, %v737_v47 }
 0x19c   : > { %v814_v54 = vmul.f32 %v1274_v51, %v767_v31 }
 0x19d   : > { %1277 = vrsqrt.f32 %v769_v52  ;;  %vm829_vm1 = vcmp.eq.f32.partialorder %v769_v52, inf  ;;  %v832_v12 = vand.u32 2147483648, %v769_v52  ;;  %vm831_vm3 = vcmp.eq.f32.partialorder %v769_v52, 0.0 }
 0x19e   : > { %v683_v57 = vpop.f32.mrb[16].mxu0  ;;  %v816_v58 = vsel %vm815_vm13, %v767_v31, %v814_v54 }
 0x19f   : > { %v738_v59 = vmul.f32 %v683_v57, %v683_v57  ;;  %v685_v60 = vpop.f32.mrb[17].mxu0  ;;  %v819_v21 = vsel %vm817_vm15, %v818_v56, %v816_v58 }
 0x1a0   : > { %v754_v62 = vmul.f32 %v685_v60, %v685_v60  ;;  %v1177_v63 = vpack.c.bf16 %v819_v21, %v812_v61 }
 0x1a2   : > { %v1276_v0 = vpop.eup %1275  ;;  %v770_v1 = vadd.f32 %v754_v62, %v738_v59  ;;  %1178 = vmatprep.subr.bf16.mxu1 %v1177_v63 }
 0x1a3   : > { %v689_v2 = vpop.f32.mrb[18].mxu0  ;;  %1180 = vmatpush3.bf16.xpose.msra.mxu1 %v1177_v63  ;;  %v821_v5 = vmul.f32 %v1276_v0, %v768_v45 }
 0x1a4   : > { %1279 = vrsqrt.f32 %v770_v1  ;;  %v739_v3 = vmul.f32 %v689_v2, %v689_v2  ;;  %v691_v4 = vpop.f32.mrb[19].mxu0  ;;  %vm836_vm4 = vcmp.eq.f32.partialorder %v770_v1, inf  ;;  %v839_v33 = vand.u32 2147483648, %v770_v1 }
 0x1a5   : > { %v755_v6 = vmul.f32 %v691_v4, %v691_v4  ;;  %v823_v9 = vsel %vm822_vm0, %v768_v45, %v821_v5  ;;  %vm838_vm6 = vcmp.eq.f32.partialorder %v770_v1, 0.0 }
 0x1a6   : > { %v826_v17 = vsel %vm824_vm2, %v825_v11, %v823_v9 }
 0x1a7   : > { %v1278_v7 = vpop.eup %1277  ;;  %v771_v8 = vadd.f32 %v755_v6, %v739_v3 }
 0x1a8   : > { %v828_v10 = vmul.f32 %v1278_v7, %v769_v52 }
 0x1a9   : > { %1281 = vrsqrt.f32 %v771_v8  ;;  %vm843_vm5 = vcmp.eq.f32.partialorder %v771_v8, inf  ;;  %v846_v34 = vand.u32 2147483648, %v771_v8  ;;  %vm845_vm7 = vcmp.eq.f32.partialorder %v771_v8, 0.0 }
 0x1aa   : > { %v695_v13 = vpop.f32.mrb[20].mxu0  ;;  %v830_v14 = vsel %vm829_vm1, %v769_v52, %v828_v10 }
 0x1ab   : > { %v740_v15 = vmul.f32 %v695_v13, %v695_v13  ;;  %v697_v16 = vpop.f32.mrb[21].mxu0  ;;  %v833_v18 = vsel %vm831_vm3, %v832_v12, %v830_v14 }
 0x1ac   : > { %v756_v19 = vmul.f32 %v697_v16, %v697_v16  ;;  %v1181_v20 = vpack.c.bf16 %v833_v18, %v826_v17 }
 0x1ae   : > { %v1280_v22 = vpop.eup %1279  ;;  %v772_v23 = vadd.f32 %v756_v19, %v740_v15  ;;  %1182 = vmatprep.subr.bf16.mxu1 %v1181_v20 }
 0x1af   : > { %v701_v24 = vpop.f32.mrb[22].mxu0  ;;  %1184 = vmatpush3.bf16.xpose.msra.mxu1 %v1181_v20  ;;  %v835_v27 = vmul.f32 %v1280_v22, %v770_v1 }
 0x1b0   : > { %1283 = vrsqrt.f32 %v772_v23  ;;  %v741_v25 = vmul.f32 %v701_v24, %v701_v24  ;;  %v703_v26 = vpop.f32.mrb[23].mxu0  ;;  %vm850_vm8 = vcmp.eq.f32.partialorder %v772_v23, inf  ;;  %v853_v54 = vand.u32 2147483648, %v772_v23 }
 0x1b1   : > { %v757_v28 = vmul.f32 %v703_v26, %v703_v26  ;;  %v837_v31 = vsel %vm836_vm4, %v770_v1, %v835_v27  ;;  %vm852_vm10 = vcmp.eq.f32.partialorder %v772_v23, 0.0 }
 0x1b2   : > { %v840_v39 = vsel %vm838_vm6, %v839_v33, %v837_v31 }
 0x1b3   : > { %v1282_v29 = vpop.eup %1281  ;;  %v773_v30 = vadd.f32 %v757_v28, %v741_v25  ;;  %v891_v28 = vld [vmem:[%s1819_s2 + $0x8] sm:$0xff] }
 0x1b4   : > { %v842_v32 = vmul.f32 %v1282_v29, %v771_v8 }
 0x1b5   : > { %1285 = vrsqrt.f32 %v773_v30  ;;  %vm857_vm9 = vcmp.eq.f32.partialorder %v773_v30, inf  ;;  %v860_v55 = vand.u32 2147483648, %v773_v30  ;;  %vm859_vm11 = vcmp.eq.f32.partialorder %v773_v30, 0.0 }
 0x1b6   : > { %v707_v35 = vpop.f32.mrb[24].mxu0  ;;  %v844_v36 = vsel %vm843_vm5, %v771_v8, %v842_v32 }
 0x1b7   : > { %v742_v37 = vmul.f32 %v707_v35, %v707_v35  ;;  %v709_v38 = vpop.f32.mrb[25].mxu0  ;;  %v847_v40 = vsel %vm845_vm7, %v846_v34, %v844_v36 }
 0x1b8   : > { %v758_v41 = vmul.f32 %v709_v38, %v709_v38  ;;  %v1185_v42 = vpack.c.bf16 %v847_v40, %v840_v39 }
 0x1ba   : > { %v1284_v43 = vpop.eup %1283  ;;  %v774_v44 = vadd.f32 %v758_v41, %v742_v37  ;;  %1186 = vmatprep.subr.bf16.mxu1 %v1185_v42 }
 0x1bb   : > { %v713_v45 = vpop.f32.mrb[26].mxu0  ;;  %1188 = vmatpush3.bf16.xpose.msra.mxu1 %v1185_v42  ;;  %v849_v48 = vmul.f32 %v1284_v43, %v772_v23 }
 0x1bc   : > { %1287 = vrsqrt.f32 %v774_v44  ;;  %v743_v46 = vmul.f32 %v713_v45, %v713_v45  ;;  %v715_v47 = vpop.f32.mrb[27].mxu0  ;;  %vm864_vm12 = vcmp.eq.f32.partialorder %v774_v44, inf  ;;  %v867_v10 = vand.u32 2147483648, %v774_v44 }
 0x1bd   : > { %v759_v49 = vmul.f32 %v715_v47, %v715_v47  ;;  %v851_v52 = vsel %vm850_vm8, %v772_v23, %v849_v48  ;;  %vm866_vm14 = vcmp.eq.f32.partialorder %v774_v44, 0.0 }
 0x1be   : > { %v854_v60 = vsel %vm852_vm10, %v853_v54, %v851_v52 }
 0x1bf   : > { %v1286_v50 = vpop.eup %1285  ;;  %v775_v51 = vadd.f32 %v759_v49, %v743_v46 }
 0x1c0   : > { %v856_v53 = vmul.f32 %v1286_v50, %v773_v30 }
 0x1c1   : > { %1289 = vrsqrt.f32 %v775_v51  ;;  %vm871_vm13 = vcmp.eq.f32.partialorder %v775_v51, inf  ;;  %v874_v11 = vand.u32 2147483648, %v775_v51  ;;  %vm873_vm15 = vcmp.eq.f32.partialorder %v775_v51, 0.0 }
 0x1c2   : > { %v719_v56 = vpop.f32.mrb[28].mxu0  ;;  %v858_v57 = vsel %vm857_vm9, %v773_v30, %v856_v53 }
 0x1c3   : > { %v744_v58 = vmul.f32 %v719_v56, %v719_v56  ;;  %v721_v59 = vpop.f32.mrb[29].mxu0  ;;  %v861_v61 = vsel %vm859_vm11, %v860_v55, %v858_v57 }
 0x1c4   : > { %v760_v21 = vmul.f32 %v721_v59, %v721_v59  ;;  %v1189_v62 = vpack.c.bf16 %v861_v61, %v854_v60 }
 0x1c6   : > { %v1288_v63 = vpop.eup %1287  ;;  %v776_v0 = vadd.f32 %v760_v21, %v744_v58  ;;  %1190 = vmatprep.subr.bf16.mxu1 %v1189_v62 }
 0x1c7   : > { %v725_v1 = vpop.f32.mrb[30].mxu0  ;;  %1192 = vmatpush3.bf16.xpose.msra.mxu1 %v1189_v62  ;;  %v863_v4 = vmul.f32 %v1288_v63, %v774_v44 }
 0x1c8   : > { %1291 = vrsqrt.f32 %v776_v0  ;;  %v745_v2 = vmul.f32 %v725_v1, %v725_v1  ;;  %v727_v3 = vpop.f32.mrb[31].mxu0  ;;  %vm878_vm0 = vcmp.eq.f32.partialorder %v776_v0, inf  ;;  %v881_v22 = vand.u32 2147483648, %v776_v0 }
 0x1c9   : > { %v761_v5 = vmul.f32 %v727_v3, %v727_v3  ;;  %v865_v8 = vsel %vm864_vm12, %v774_v44, %v863_v4  ;;  %vm880_vm2 = vcmp.eq.f32.partialorder %v776_v0, 0.0 }
 0x1ca   : > { %v868_v13 = vsel %vm866_vm14, %v867_v10, %v865_v8 }
 0x1cb   : > { %v1290_v6 = vpop.eup %1289  ;;  %v777_v7 = vadd.f32 %v761_v5, %v745_v2 }
 0x1cc   : > { %v870_v9 = vmul.f32 %v1290_v6, %v775_v51 }
 0x1cd   : > { %1293 = vrsqrt.f32 %v777_v7  ;;  %vm885_vm1 = vcmp.eq.f32.partialorder %v777_v7, inf  ;;  %v888_v23 = vand.u32 2147483648, %v777_v7  ;;  %vm887_vm3 = vcmp.eq.f32.partialorder %v777_v7, 0.0 }
 0x1ce   : > { %v872_v12 = vsel %vm871_vm13, %v775_v51, %v870_v9 }
 0x1cf   : > { %v875_v14 = vsel %vm873_vm15, %v874_v11, %v872_v12 }
 0x1d0   : > { %v1193_v15 = vpack.c.bf16 %v875_v14, %v868_v13 }
 0x1d2   : > { %v1292_v16 = vpop.eup %1291  ;;  %1194 = vmatprep.subr.bf16.mxu1 %v1193_v15 }
 0x1d3   : > { %1196 = vmatpush3.bf16.xpose.msra.mxu1 %v1193_v15  ;;  %v877_v17 = vmul.f32 %v1292_v16, %v776_v0 }
 0x1d5   : > { %v879_v19 = vsel %vm878_vm0, %v776_v0, %v877_v17 }
 0x1d6   : > { %v882_v25 = vsel %vm880_vm2, %v881_v22, %v879_v19 }
 0x1d7   : > { %v1294_v18 = vpop.eup %1293 }
 0x1d8   : > { %v884_v20 = vmul.f32 %v1294_v18, %v777_v7 }
 0x1da   : > { %v886_v24 = vsel %vm885_vm1, %v777_v7, %v884_v20 }
 0x1db   : > { %v889_v26 = vsel %vm887_vm3, %v888_v23, %v886_v24 }
 0x1dc   : > { %v1197_v27 = vpack.c.bf16 %v889_v26, %v882_v25 }
 0x1de   : > { %1198 = vmatprep.subr.bf16.mxu1 %v1197_v27 }
 0x1df   : > { %1200 = vmatpush3.bf16.xpose.msra.mxu1 %v1197_v27 }
 0x1e6   : > { %1135 = vmatmul.mubr.f32.vlgmr.msra.gmra.mrb[0].mxu1 %v891_v28 }
 0x2b9   : > { %v1136_v29 = vpop.f32.mrb[0].mxu1 }
 0x2ba   : > { %v968_v30 = vmax.f32 %v1136_v29, 1e-05  ;;  %v958_v31 = vpop.f32.mrb[1].mxu1 }
 0x2bb   : > { %v967_v32 = vmax.f32 %v958_v31, 1e-05 }
 0x2bc   : > { %1295 = vlog2.f32 %v968_v30 }
 0x2bd   : > { %1297 = vlog2.f32 %v967_v32 }
 0x2c6   : > { %v1296_v33 = vpop.eup %1295 }
 0x2c7   : > { %v1298_v34 = vpop.eup %1297  ;;  %v972_v35 = vmul.f32 0.6931472, %v1296_v33 }
 0x2c8   : > { %v970_v36 = vmul.f32 0.6931472, %v1298_v34 }
 0x2c9   : > { %974 = vst [vmem:[%s187_s21 + $0x8] sm:$0xff] %v972_v35 }
 0x2ca   : > { %973 = vst [vmem:[%s187_s21] sm:$0xff] %v970_v36 }
 0x2cb   : > { %1312 = shalt.err (!%p1309_p5)
}
 0x2cc   : > { %s1313_s11 = scalar_lea.hbm %s1769_s4, 256  ;;  %s1317_s26 = scalar_lea.hbm %s1820_s3, 512 }
 0x2cd   : > { %p1314_p6 = scmp.ne.s32.totalorder %s1769_s4, %s1313_s11  ;;  %p1318_p10 = scmp.lt.u32.totalorder %s1769_s4, %s1820_s3 }
 0x2ce   : > { %p1319_p11 = scmp.lt.u32.totalorder %s1317_s26, %s1313_s11  ;;  %p1321_p13 = scmp.lt.u32.totalorder %s1313_s11, %s1769_s4 }
 0x2cf   : > { %p1315_p7 = pnand %p1314_p6, %p1446_p4 }
 0x2d0   : > { %p1320_p12 = por %p1319_p11, %p1318_p10 }
 0x2d1   : > { %p1316_p9 = pneg %p1315_p7 }
 0x2d2   : > { %p1322_p0 = por %p1321_p13, %p1320_p12 }
 0x2d4   : > { %p1323_p1 = pnand %p1322_p0, %p1316_p9 }
 0x2d6   : > { %1326 = shalt.err (!%p1323_p1)
}
 0x2d7   : > { %s1384_s19 = smov 128   ;;  %s1385_s21 = smov 8  }
 0x2d8   : > { %1202 = dma.vmem_to_hbm [thread:$0]  (%p1446_p4), %s1764_s27, 256, %s1769_s4, %s1771_s5, %s1384_s19, %s1384_s19, %s1385_s21  }
 0x2d9 PF: > { %p1208_p2 = scmp.ge.s32.totalorder %s1377_s17, 2  ;;  %s1005_s28 = sand.u32 1, %s1357_s12  }
 0x2da   : > { %s1006_s29 = scalar_lea.sflag [#allocation4], %s1005_s28 }
 0x2db   : > { %p1205_p3 = pnand %p1208_p2, %p1453_p8 }
 0x2dd   : > { %1352 = dma.done.wait (!%p1205_p3), %s1006_s29, 256  }
 0x2de   : > { %1354 = vsyncadd (!%p1205_p3), %s1006_s29, 4294967040  ;;  %s16_s17 = sadd.s32 1, %s1377_s17   ;;  %s1823_s12 = smov %s1361_s13 }
 0x2df   : > { %p13_p5 = scmp.ge.s32.totalorder %s16_s17, 4   ;;  %s1824_s13 = smov %s1365_s14 }
 0x2e0   : > { %s1825_s14 = smov %s1459_s25  ;;  %s1826_s15 = smov %s1373_s16 }
 0x2e1   : > { %s1827_s16 = smov %s1829_s20  ;;  %15 = sbr.rel (!%p13_p5) target bundleno = 4 (0x4), region = 67 }
 0x2e8   :  { %1011 = vsyncpa [#allocation4], 1 }
 0x2e9   :  { %1013 = vsyncpa [#allocation4 + $0x1], 1 }

</bundles_post_ra>
